<compile_context>
chip_gen: v7x
topology: tpu7x:2x2x1
jax: 0.10.0
libtpu: 0.0.40
codegen_flags: <defaults>
</compile_context>

<pallas_src>
import jax
import jax.numpy as jnp
from jax.experimental import pallas as pl
from jax.experimental.pallas import tpu as pltpu


def lstm_kernel(x_ref, w_x_ref, b1_ref, w_fused_ref, b2_ref,
                w_lin_ref, b_lin_ref, w_out_ref, b_out_ref,
                out_ref, feat_ref):
    T = out_ref.shape[0]
    H = w_lin_ref.shape[0]
    H4 = 4 * H

    # ---- Off the serial chain: layer-1 input projection for the whole
    # sequence as one GEMM (bias b1 folded in, g-gate columns pre-scaled).
    x_bf = x_ref[...].astype(jnp.bfloat16)                               # (T, I)
    xproj1 = jnp.dot(x_bf, w_x_ref[...],
                     preferred_element_type=jnp.float32) + b1_ref[...]   # (T, 4H) f32
    w_fused = w_fused_ref[...]                                           # (2H, 8H) bf16
    b2 = b2_ref[...]                                                     # (1, 4H) f32

    # ---- Skewed, fused recurrence.
    # Round r computes layer-1 step r (for r < T) and layer-2 step r-1
    # (for r >= 1) off ONE MXU pass:
    #   [h1_{r-1} | h2_{r-2}] @ [[w_hh1, w_ih2], [0, w_hh2]]
    # Layer-1 half gets xproj1[r] (= x_r @ w_ih1 + b1); layer-2 half gets b2.
    # g-gate columns of every weight/bias were pre-scaled by 2, so the single
    # sigmoid pass also yields the tanh gate via tanh(x) = 2*sigmoid(2x) - 1.
    h1 = jnp.zeros((1, H), jnp.float32)
    c1 = jnp.zeros((1, H), jnp.float32)
    h2 = jnp.zeros((1, H), jnp.float32)
    c2 = jnp.zeros((1, H), jnp.float32)

    for r in range(T + 1):                      # static & tiny -> fully unrolled
        hcat = jnp.concatenate([h1, h2], axis=1).astype(jnp.bfloat16)    # (1, 2H)
        gboth = jnp.dot(hcat, w_fused,
                        preferred_element_type=jnp.float32)              # (1, 8H) f32

        if r < T:                               # layer-1 cell, timestep r
            s1 = jax.nn.sigmoid(gboth[:, :H4] + xproj1[r:r + 1, :])
            i1 = s1[:, 0 * H:1 * H]
            f1 = s1[:, 1 * H:2 * H]
            g1 = 2.0 * s1[:, 2 * H:3 * H] - 1.0   # == tanh of the unscaled gate
            o1 = s1[:, 3 * H:4 * H]
            c1 = f1 * c1 + i1 * g1
            h1 = o1 * jnp.tanh(c1)

        if r >= 1:                              # layer-2 cell, timestep r-1
            s2 = jax.nn.sigmoid(gboth[:, H4:] + b2)
            i2 = s2[:, 0 * H:1 * H]
            f2 = s2[:, 1 * H:2 * H]
            g2 = 2.0 * s2[:, 2 * H:3 * H] - 1.0
            o2 = s2[:, 3 * H:4 * H]
            c2 = f2 * c2 + i2 * g2
            h2 = o2 * jnp.tanh(c2)
            feat_ref[pl.ds(r - 1, 1), :] = h2   # one row store; no concat / live vregs

    # ---- Head (off the serial chain):
    # linear -> relu -> SAME linear -> relu -> output_linear.
    w_lin = w_lin_ref[...]
    b_lin = b_lin_ref[...]
    feat = feat_ref[...].astype(jnp.bfloat16)                            # (T, H)
    z = jnp.maximum(jnp.dot(feat, w_lin,
                            preferred_element_type=jnp.float32) + b_lin, 0.0)
    z = jnp.maximum(jnp.dot(z.astype(jnp.bfloat16), w_lin,
                            preferred_element_type=jnp.float32) + b_lin, 0.0)
    pred = jnp.dot(z.astype(jnp.bfloat16), w_out_ref[...],
                   preferred_element_type=jnp.float32) + b_out_ref[...]
    out_ref[...] = pred.astype(out_ref.dtype)


def pack_params(params):
    """One-time parameter packing (analogous to converting a state dict):
    * pre-scale the g-gate columns by 2 (so tanh(x) = 2*sigmoid(2x) - 1),
    * fuse both layers' recurrent weights into one (2H, 8H) matrix
          [[w_hh1, w_ih2], [0, w_hh2]],
    * cast all matmul operands to bf16 (f32 accumulation inside the kernel)."""
    H = params["w_hh1"].shape[0]

    def scale_g(w):  # double the "g" gate columns [2H, 3H) of a (*, 4H) tensor
        return w.at[:, 2 * H:3 * H].multiply(2.0)

    w_ih1 = scale_g(params["w_ih1"])
    w_hh1 = scale_g(params["w_hh1"])
    b1 = scale_g(params["b1"])
    w_ih2 = scale_g(params["w_ih2"])
    w_hh2 = scale_g(params["w_hh2"])
    b2 = scale_g(params["b2"])

    w_fused = jnp.concatenate(
        [jnp.concatenate([w_hh1, w_ih2], axis=1),                      # rows 0:H  (h1)
         jnp.concatenate([jnp.zeros_like(w_hh2), w_hh2], axis=1)],     # rows H:2H (h2)
        axis=0)                                                        # (2H, 8H)

    return {
        "w_x":     w_ih1.astype(jnp.bfloat16),      # (I, 4H)
        "b1":      b1.astype(jnp.float32),          # (1, 4H)
        "w_fused": w_fused.astype(jnp.bfloat16),    # (2H, 8H)
        "b2":      b2.astype(jnp.float32),          # (1, 4H)
        "w_lin":   params["w_lin"].astype(jnp.bfloat16),
        "b_lin":   params["b_lin"].astype(jnp.float32),
        "w_out":   params["w_out"].astype(jnp.bfloat16),
        "b_out":   params["b_out"].astype(jnp.float32),
    }


def lstm_forward(x, packed):
    """x: (T, N, I) f32; packed: output of pack_params(). Returns (T, O) f32."""
    T, N, _ = x.shape
    H = packed["w_lin"].shape[0]
    O = packed["w_out"].shape[1]
    # Only batch row N-1 reaches the module's output (lstm_hidden_out[:, -1, :]);
    # LSTM batch rows are independent, so drop the dead rows up front.
    x_last = x[:, N - 1, :]                                              # (T, I)
    args = (x_last,
            packed["w_x"], packed["b1"], packed["w_fused"], packed["b2"],
            packed["w_lin"], packed["b_lin"], packed["w_out"], packed["b_out"])
    vmem = pltpu.MemorySpace.VMEM
    return pl.pallas_call(
        lstm_kernel,
        out_shape=jax.ShapeDtypeStruct((T, O), jnp.float32),
        in_specs=[pl.BlockSpec(memory_space=vmem) for _ in args],
        out_specs=pl.BlockSpec(memory_space=vmem),
        scratch_shapes=[pltpu.VMEM((T, H), jnp.float32)],               # h2 rows (feat)
    )(*args)
    # TODO(synk): when called per-sequence in production, batch many sequences
    # into one call with a leading "parallel" grid axis (engages both v7x TCs
    # and amortizes launch overhead); single-call semantics kept here.


def lstm_reference(x, params):
    """Pure-JAX f32 reference mirroring the PyTorch forward (full batch)."""
    def cell(x_t, h, c, w_ih, w_hh, b):
        H = h.shape[1]
        g = x_t @ w_ih + h @ w_hh + b
        i = jax.nn.sigmoid(g[:, :H])
        f = jax.nn.sigmoid(g[:, H:2 * H])
        gg = jnp.tanh(g[:, 2 * H:3 * H])
        o = jax.nn.sigmoid(g[:, 3 * H:])
        c = f * c + i * gg
        return o * jnp.tanh(c), c

    T, N, _ = x.shape
    H = params["w_hh1"].shape[0]
    h1 = c1 = h2 = c2 = jnp.zeros((N, H), jnp.float32)
    outs = []
    for t in range(T):
        h1, c1 = cell(x[t], h1, c1, params["w_ih1"], params["w_hh1"], params["b1"])
        h2, c2 = cell(h1, h2, c2, params["w_ih2"], params["w_hh2"], params["b2"])
        outs.append(h2)
    out2 = jnp.stack(outs)                 # (T, N, H)
    feat = out2[:, -1, :]                  # (T, H) -- last batch element
    z = jnp.maximum(feat @ params["w_lin"] + params["b_lin"], 0.0)
    z = jnp.maximum(z @ params["w_lin"] + params["b_lin"], 0.0)
    return z @ params["w_out"] + params["b_out"]


def init_params(key, input_size, hidden, output_size):
    ks = jax.random.split(key, 12)
    s = 1.0 / float(hidden) ** 0.5
    u = lambda k, shape: jax.random.uniform(k, shape, jnp.float32, -s, s)
    return {
        "w_ih1": u(ks[0], (input_size, 4 * hidden)),
        "w_hh1": u(ks[1], (hidden, 4 * hidden)),
        "b1":    u(ks[2], (1, 4 * hidden)) + u(ks[3], (1, 4 * hidden)),  # b_ih + b_hh
        "w_ih2": u(ks[4], (hidden, 4 * hidden)),
        "w_hh2": u(ks[5], (hidden, 4 * hidden)),
        "b2":    u(ks[6], (1, 4 * hidden)) + u(ks[7], (1, 4 * hidden)),
        "w_lin": u(ks[8], (hidden, hidden)),
        "b_lin": u(ks[9], (1, hidden)),
        "w_out": u(ks[10], (hidden, output_size)),
        "b_out": u(ks[11], (1, output_size)),
    }


if __name__ == "__main__":
    T, N, I, H, O = 8, 2, 13, 32, 3     # seq_len, batch, input, hidden, output

    key = jax.random.PRNGKey(0)
    k_x, k_p = jax.random.split(key)
    x = jax.random.normal(k_x, (T, N, I), dtype=jnp.float32)
    params = init_params(k_p, I, H, O)
    packed = pack_params(params)        # one-time packing (state-dict conversion)

    out = jax.block_until_ready(lstm_forward(x, packed))
    ref = jax.block_until_ready(lstm_reference(x, params))

    assert out.shape == (T, O), out.shape
    # The kernel feeds the MXU bf16 operands (its native single-pass input
    # format; XLA's default TPU matmul precision applies the same rounding)
    # with f32 accumulation, so compare at bf16-level tolerance.
    err = jnp.max(jnp.abs(out - ref))
    assert jnp.allclose(out, ref, atol=5e-3, rtol=5e-3), f"max abs err {err}"

    print("KERNEL_OK")
</pallas_src>

<mosaic_0001>
module attributes {stable_mosaic.version = 11 : i64} {
  func.func @lstm_kernel(%arg0: memref<8x13xf32, #tpu.memory_space<vmem>>, %arg1: memref<13x128xbf16, #tpu.memory_space<vmem>>, %arg2: memref<1x128xf32, #tpu.memory_space<vmem>>, %arg3: memref<64x256xbf16, #tpu.memory_space<vmem>>, %arg4: memref<1x128xf32, #tpu.memory_space<vmem>>, %arg5: memref<32x32xbf16, #tpu.memory_space<vmem>>, %arg6: memref<1x32xf32, #tpu.memory_space<vmem>>, %arg7: memref<32x3xbf16, #tpu.memory_space<vmem>>, %arg8: memref<1x3xf32, #tpu.memory_space<vmem>>, %arg9: memref<8x3xf32, #tpu.memory_space<vmem>>, %arg10: memref<8x32xf32, #tpu.memory_space<vmem>>) attributes {dimension_semantics = [], scalar_prefetch = 0 : i64, scratch_operands = 1 : i64, tpu.core_type = #tpu.core_type<tc>} {
    %c0 = arith.constant 0 : index
    %c0_0 = arith.constant 0 : index
    %0 = vector.load %arg0[%c0, %c0_0] : memref<8x13xf32, #tpu.memory_space<vmem>>, vector<8x13xf32>
    %1 = arith.truncf %0 : vector<8x13xf32> to vector<8x13xbf16>
    %c0_1 = arith.constant 0 : index
    %c0_2 = arith.constant 0 : index
    %2 = vector.load %arg1[%c0_1, %c0_2] : memref<13x128xbf16, #tpu.memory_space<vmem>>, vector<13x128xbf16>
    %cst = arith.constant dense<0.000000e+00> : vector<8x128xf32>
    %3 = tpu.matmul %1, %2, %cst {dimension_numbers = #tpu.dot_dimension_numbers<[1], [0], [0], [1], [0, 0, 1, 1], [], []>} : vector<8x13xbf16>, vector<13x128xbf16>, vector<8x128xf32> -> vector<8x128xf32>
    %c0_3 = arith.constant 0 : index
    %c0_4 = arith.constant 0 : index
    %4 = vector.load %arg2[%c0_3, %c0_4] : memref<1x128xf32, #tpu.memory_space<vmem>>, vector<1x128xf32>
    %5 = vector.broadcast %4 : vector<1x128xf32> to vector<8x128xf32>
    %6 = arith.addf %3, %5 : vector<8x128xf32>
    %c0_5 = arith.constant 0 : index
    %c0_6 = arith.constant 0 : index
    %7 = vector.load %arg3[%c0_5, %c0_6] : memref<64x256xbf16, #tpu.memory_space<vmem>>, vector<64x256xbf16>
    %c0_7 = arith.constant 0 : index
    %c0_8 = arith.constant 0 : index
    %8 = vector.load %arg4[%c0_7, %c0_8] : memref<1x128xf32, #tpu.memory_space<vmem>>, vector<1x128xf32>
    %cst_9 = arith.constant 0.000000e+00 : f32
    %9 = vector.broadcast %cst_9 : f32 to vector<1x32xf32>
    %cst_10 = arith.constant 0.000000e+00 : f32
    %10 = vector.broadcast %cst_10 : f32 to vector<1x32xf32>
    %cst_11 = arith.constant 0.000000e+00 : f32
    %11 = vector.broadcast %cst_11 : f32 to vector<1x32xf32>
    %cst_12 = arith.constant 0.000000e+00 : f32
    %12 = vector.broadcast %cst_12 : f32 to vector<1x32xf32>
    %13 = tpu.concatenate %9, %11 in 1 : vector<1x32xf32>, vector<1x32xf32> -> vector<1x64xf32>
    %14 = arith.truncf %13 : vector<1x64xf32> to vector<1x64xbf16>
    %cst_13 = arith.constant dense<0.000000e+00> : vector<1x256xf32>
    %15 = tpu.matmul %14, %7, %cst_13 {dimension_numbers = #tpu.dot_dimension_numbers<[1], [0], [0], [1], [0, 0, 1, 1], [], []>} : vector<1x64xbf16>, vector<64x256xbf16>, vector<1x256xf32> -> vector<1x256xf32>
    %16 = vector.extract_strided_slice %15 {offsets = [0, 0], sizes = [1, 128], strides = [1, 1]} : vector<1x256xf32> to vector<1x128xf32>
    %17 = vector.extract_strided_slice %6 {offsets = [0, 0], sizes = [1, 128], strides = [1, 1]} : vector<8x128xf32> to vector<1x128xf32>
    %18 = arith.addf %16, %17 : vector<1x128xf32>
    %19 = arith.negf %18 : vector<1x128xf32>
    %20 = math.exp %19 : vector<1x128xf32>
    %cst_14 = arith.constant 1.000000e+00 : f32
    %21 = vector.broadcast %cst_14 : f32 to vector<1x128xf32>
    %22 = arith.addf %21, %20 : vector<1x128xf32>
    %23 = arith.divf %21, %22 : vector<1x128xf32>
    %24 = vector.extract_strided_slice %23 {offsets = [0, 0], sizes = [1, 32], strides = [1, 1]} : vector<1x128xf32> to vector<1x32xf32>
    %25 = vector.extract_strided_slice %23 {offsets = [0, 32], sizes = [1, 32], strides = [1, 1]} : vector<1x128xf32> to vector<1x32xf32>
    %26 = vector.extract_strided_slice %23 {offsets = [0, 64], sizes = [1, 32], strides = [1, 1]} : vector<1x128xf32> to vector<1x32xf32>
    %cst_15 = arith.constant 2.000000e+00 : f32
    %27 = vector.broadcast %cst_15 : f32 to vector<1x32xf32>
    %28 = arith.mulf %27, %26 : vector<1x32xf32>
    %cst_16 = arith.constant 1.000000e+00 : f32
    %29 = vector.broadcast %cst_16 : f32 to vector<1x32xf32>
    %30 = arith.subf %28, %29 : vector<1x32xf32>
    %31 = vector.extract_strided_slice %23 {offsets = [0, 96], sizes = [1, 32], strides = [1, 1]} : vector<1x128xf32> to vector<1x32xf32>
    %32 = arith.mulf %25, %10 : vector<1x32xf32>
    %33 = arith.mulf %24, %30 : vector<1x32xf32>
    %34 = arith.addf %32, %33 : vector<1x32xf32>
    %35 = math.tanh %34 : vector<1x32xf32>
    %36 = arith.mulf %31, %35 : vector<1x32xf32>
    %37 = tpu.concatenate %36, %11 in 1 : vector<1x32xf32>, vector<1x32xf32> -> vector<1x64xf32>
    %38 = arith.truncf %37 : vector<1x64xf32> to vector<1x64xbf16>
    %cst_17 = arith.constant dense<0.000000e+00> : vector<1x256xf32>
    %39 = tpu.matmul %38, %7, %cst_17 {dimension_numbers = #tpu.dot_dimension_numbers<[1], [0], [0], [1], [0, 0, 1, 1], [], []>} : vector<1x64xbf16>, vector<64x256xbf16>, vector<1x256xf32> -> vector<1x256xf32>
    %40 = vector.extract_strided_slice %39 {offsets = [0, 0], sizes = [1, 128], strides = [1, 1]} : vector<1x256xf32> to vector<1x128xf32>
    %41 = vector.extract_strided_slice %6 {offsets = [1, 0], sizes = [1, 128], strides = [1, 1]} : vector<8x128xf32> to vector<1x128xf32>
    %42 = arith.addf %40, %41 : vector<1x128xf32>
    %43 = arith.negf %42 : vector<1x128xf32>
    %44 = math.exp %43 : vector<1x128xf32>
    %cst_18 = arith.constant 1.000000e+00 : f32
    %45 = vector.broadcast %cst_18 : f32 to vector<1x128xf32>
    %46 = arith.addf %45, %44 : vector<1x128xf32>
    %47 = arith.divf %45, %46 : vector<1x128xf32>
    %48 = vector.extract_strided_slice %47 {offsets = [0, 0], sizes = [1, 32], strides = [1, 1]} : vector<1x128xf32> to vector<1x32xf32>
    %49 = vector.extract_strided_slice %47 {offsets = [0, 32], sizes = [1, 32], strides = [1, 1]} : vector<1x128xf32> to vector<1x32xf32>
    %50 = vector.extract_strided_slice %47 {offsets = [0, 64], sizes = [1, 32], strides = [1, 1]} : vector<1x128xf32> to vector<1x32xf32>
    %cst_19 = arith.constant 2.000000e+00 : f32
    %51 = vector.broadcast %cst_19 : f32 to vector<1x32xf32>
    %52 = arith.mulf %51, %50 : vector<1x32xf32>
    %cst_20 = arith.constant 1.000000e+00 : f32
    %53 = vector.broadcast %cst_20 : f32 to vector<1x32xf32>
    %54 = arith.subf %52, %53 : vector<1x32xf32>
    %55 = vector.extract_strided_slice %47 {offsets = [0, 96], sizes = [1, 32], strides = [1, 1]} : vector<1x128xf32> to vector<1x32xf32>
    %56 = arith.mulf %49, %34 : vector<1x32xf32>
    %57 = arith.mulf %48, %54 : vector<1x32xf32>
    %58 = arith.addf %56, %57 : vector<1x32xf32>
    %59 = math.tanh %58 : vector<1x32xf32>
    %60 = arith.mulf %55, %59 : vector<1x32xf32>
    %61 = vector.extract_strided_slice %39 {offsets = [0, 128], sizes = [1, 128], strides = [1, 1]} : vector<1x256xf32> to vector<1x128xf32>
    %62 = arith.addf %61, %8 : vector<1x128xf32>
    %63 = arith.negf %62 : vector<1x128xf32>
    %64 = math.exp %63 : vector<1x128xf32>
    %cst_21 = arith.constant 1.000000e+00 : f32
    %65 = vector.broadcast %cst_21 : f32 to vector<1x128xf32>
    %66 = arith.addf %65, %64 : vector<1x128xf32>
    %67 = arith.divf %65, %66 : vector<1x128xf32>
    %68 = vector.extract_strided_slice %67 {offsets = [0, 0], sizes = [1, 32], strides = [1, 1]} : vector<1x128xf32> to vector<1x32xf32>
    %69 = vector.extract_strided_slice %67 {offsets = [0, 32], sizes = [1, 32], strides = [1, 1]} : vector<1x128xf32> to vector<1x32xf32>
    %70 = vector.extract_strided_slice %67 {offsets = [0, 64], sizes = [1, 32], strides = [1, 1]} : vector<1x128xf32> to vector<1x32xf32>
    %cst_22 = arith.constant 2.000000e+00 : f32
    %71 = vector.broadcast %cst_22 : f32 to vector<1x32xf32>
    %72 = arith.mulf %71, %70 : vector<1x32xf32>
    %cst_23 = arith.constant 1.000000e+00 : f32
    %73 = vector.broadcast %cst_23 : f32 to vector<1x32xf32>
    %74 = arith.subf %72, %73 : vector<1x32xf32>
    %75 = vector.extract_strided_slice %67 {offsets = [0, 96], sizes = [1, 32], strides = [1, 1]} : vector<1x128xf32> to vector<1x32xf32>
    %76 = arith.mulf %69, %12 : vector<1x32xf32>
    %77 = arith.mulf %68, %74 : vector<1x32xf32>
    %78 = arith.addf %76, %77 : vector<1x32xf32>
    %79 = math.tanh %78 : vector<1x32xf32>
    %80 = arith.mulf %75, %79 : vector<1x32xf32>
    %c0_24 = arith.constant 0 : index
    %c0_25 = arith.constant 0 : index
    %81 = vector.load %arg10[%c0_24, %c0_25] : memref<8x32xf32, #tpu.memory_space<vmem>>, vector<1x32xf32>
    tpu.vector_store %arg10[%c0_24, %c0_25], %80 {strides = array<i32>} : memref<8x32xf32, #tpu.memory_space<vmem>>, vector<1x32xf32>,
    %82 = tpu.concatenate %60, %80 in 1 : vector<1x32xf32>, vector<1x32xf32> -> vector<1x64xf32>
    %83 = arith.truncf %82 : vector<1x64xf32> to vector<1x64xbf16>
    %cst_26 = arith.constant dense<0.000000e+00> : vector<1x256xf32>
    %84 = tpu.matmul %83, %7, %cst_26 {dimension_numbers = #tpu.dot_dimension_numbers<[1], [0], [0], [1], [0, 0, 1, 1], [], []>} : vector<1x64xbf16>, vector<64x256xbf16>, vector<1x256xf32> -> vector<1x256xf32>
    %85 = vector.extract_strided_slice %84 {offsets = [0, 0], sizes = [1, 128], strides = [1, 1]} : vector<1x256xf32> to vector<1x128xf32>
    %86 = vector.extract_strided_slice %6 {offsets = [2, 0], sizes = [1, 128], strides = [1, 1]} : vector<8x128xf32> to vector<1x128xf32>
    %87 = arith.addf %85, %86 : vector<1x128xf32>
    %88 = arith.negf %87 : vector<1x128xf32>
    %89 = math.exp %88 : vector<1x128xf32>
    %cst_27 = arith.constant 1.000000e+00 : f32
    %90 = vector.broadcast %cst_27 : f32 to vector<1x128xf32>
    %91 = arith.addf %90, %89 : vector<1x128xf32>
    %92 = arith.divf %90, %91 : vector<1x128xf32>
    %93 = vector.extract_strided_slice %92 {offsets = [0, 0], sizes = [1, 32], strides = [1, 1]} : vector<1x128xf32> to vector<1x32xf32>
    %94 = vector.extract_strided_slice %92 {offsets = [0, 32], sizes = [1, 32], strides = [1, 1]} : vector<1x128xf32> to vector<1x32xf32>
    %95 = vector.extract_strided_slice %92 {offsets = [0, 64], sizes = [1, 32], strides = [1, 1]} : vector<1x128xf32> to vector<1x32xf32>
    %cst_28 = arith.constant 2.000000e+00 : f32
    %96 = vector.broadcast %cst_28 : f32 to vector<1x32xf32>
    %97 = arith.mulf %96, %95 : vector<1x32xf32>
    %cst_29 = arith.constant 1.000000e+00 : f32
    %98 = vector.broadcast %cst_29 : f32 to vector<1x32xf32>
    %99 = arith.subf %97, %98 : vector<1x32xf32>
    %100 = vector.extract_strided_slice %92 {offsets = [0, 96], sizes = [1, 32], strides = [1, 1]} : vector<1x128xf32> to vector<1x32xf32>
    %101 = arith.mulf %94, %58 : vector<1x32xf32>
    %102 = arith.mulf %93, %99 : vector<1x32xf32>
    %103 = arith.addf %101, %102 : vector<1x32xf32>
    %104 = math.tanh %103 : vector<1x32xf32>
    %105 = arith.mulf %100, %104 : vector<1x32xf32>
    %106 = vector.extract_strided_slice %84 {offsets = [0, 128], sizes = [1, 128], strides = [1, 1]} : vector<1x256xf32> to vector<1x128xf32>
    %107 = arith.addf %106, %8 : vector<1x128xf32>
    %108 = arith.negf %107 : vector<1x128xf32>
    %109 = math.exp %108 : vector<1x128xf32>
    %cst_30 = arith.constant 1.000000e+00 : f32
    %110 = vector.broadcast %cst_30 : f32 to vector<1x128xf32>
    %111 = arith.addf %110, %109 : vector<1x128xf32>
    %112 = arith.divf %110, %111 : vector<1x128xf32>
    %113 = vector.extract_strided_slice %112 {offsets = [0, 0], sizes = [1, 32], strides = [1, 1]} : vector<1x128xf32> to vector<1x32xf32>
    %114 = vector.extract_strided_slice %112 {offsets = [0, 32], sizes = [1, 32], strides = [1, 1]} : vector<1x128xf32> to vector<1x32xf32>
    %115 = vector.extract_strided_slice %112 {offsets = [0, 64], sizes = [1, 32], strides = [1, 1]} : vector<1x128xf32> to vector<1x32xf32>
    %cst_31 = arith.constant 2.000000e+00 : f32
    %116 = vector.broadcast %cst_31 : f32 to vector<1x32xf32>
    %117 = arith.mulf %116, %115 : vector<1x32xf32>
    %cst_32 = arith.constant 1.000000e+00 : f32
    %118 = vector.broadcast %cst_32 : f32 to vector<1x32xf32>
    %119 = arith.subf %117, %118 : vector<1x32xf32>
    %120 = vector.extract_strided_slice %112 {offsets = [0, 96], sizes = [1, 32], strides = [1, 1]} : vector<1x128xf32> to vector<1x32xf32>
    %121 = arith.mulf %114, %78 : vector<1x32xf32>
    %122 = arith.mulf %113, %119 : vector<1x32xf32>
    %123 = arith.addf %121, %122 : vector<1x32xf32>
    %124 = math.tanh %123 : vector<1x32xf32>
    %125 = arith.mulf %120, %124 : vector<1x32xf32>
    %c1 = arith.constant 1 : index
    %c0_33 = arith.constant 0 : index
    %126 = vector.load %arg10[%c1, %c0_33] : memref<8x32xf32, #tpu.memory_space<vmem>>, vector<1x32xf32>
    tpu.vector_store %arg10[%c1, %c0_33], %125 {strides = array<i32>} : memref<8x32xf32, #tpu.memory_space<vmem>>, vector<1x32xf32>,
    %127 = tpu.concatenate %105, %125 in 1 : vector<1x32xf32>, vector<1x32xf32> -> vector<1x64xf32>
    %128 = arith.truncf %127 : vector<1x64xf32> to vector<1x64xbf16>
    %cst_34 = arith.constant dense<0.000000e+00> : vector<1x256xf32>
    %129 = tpu.matmul %128, %7, %cst_34 {dimension_numbers = #tpu.dot_dimension_numbers<[1], [0], [0], [1], [0, 0, 1, 1], [], []>} : vector<1x64xbf16>, vector<64x256xbf16>, vector<1x256xf32> -> vector<1x256xf32>
    %130 = vector.extract_strided_slice %129 {offsets = [0, 0], sizes = [1, 128], strides = [1, 1]} : vector<1x256xf32> to vector<1x128xf32>
    %131 = vector.extract_strided_slice %6 {offsets = [3, 0], sizes = [1, 128], strides = [1, 1]} : vector<8x128xf32> to vector<1x128xf32>
    %132 = arith.addf %130, %131 : vector<1x128xf32>
    %133 = arith.negf %132 : vector<1x128xf32>
    %134 = math.exp %133 : vector<1x128xf32>
    %cst_35 = arith.constant 1.000000e+00 : f32
    %135 = vector.broadcast %cst_35 : f32 to vector<1x128xf32>
    %136 = arith.addf %135, %134 : vector<1x128xf32>
    %137 = arith.divf %135, %136 : vector<1x128xf32>
    %138 = vector.extract_strided_slice %137 {offsets = [0, 0], sizes = [1, 32], strides = [1, 1]} : vector<1x128xf32> to vector<1x32xf32>
    %139 = vector.extract_strided_slice %137 {offsets = [0, 32], sizes = [1, 32], strides = [1, 1]} : vector<1x128xf32> to vector<1x32xf32>
    %140 = vector.extract_strided_slice %137 {offsets = [0, 64], sizes = [1, 32], strides = [1, 1]} : vector<1x128xf32> to vector<1x32xf32>
    %cst_36 = arith.constant 2.000000e+00 : f32
    %141 = vector.broadcast %cst_36 : f32 to vector<1x32xf32>
    %142 = arith.mulf %141, %140 : vector<1x32xf32>
    %cst_37 = arith.constant 1.000000e+00 : f32
    %143 = vector.broadcast %cst_37 : f32 to vector<1x32xf32>
    %144 = arith.subf %142, %143 : vector<1x32xf32>
    %145 = vector.extract_strided_slice %137 {offsets = [0, 96], sizes = [1, 32], strides = [1, 1]} : vector<1x128xf32> to vector<1x32xf32>
    %146 = arith.mulf %139, %103 : vector<1x32xf32>
    %147 = arith.mulf %138, %144 : vector<1x32xf32>
    %148 = arith.addf %146, %147 : vector<1x32xf32>
    %149 = math.tanh %148 : vector<1x32xf32>
    %150 = arith.mulf %145, %149 : vector<1x32xf32>
    %151 = vector.extract_strided_slice %129 {offsets = [0, 128], sizes = [1, 128], strides = [1, 1]} : vector<1x256xf32> to vector<1x128xf32>
    %152 = arith.addf %151, %8 : vector<1x128xf32>
    %153 = arith.negf %152 : vector<1x128xf32>
    %154 = math.exp %153 : vector<1x128xf32>
    %cst_38 = arith.constant 1.000000e+00 : f32
    %155 = vector.broadcast %cst_38 : f32 to vector<1x128xf32>
    %156 = arith.addf %155, %154 : vector<1x128xf32>
    %157 = arith.divf %155, %156 : vector<1x128xf32>
    %158 = vector.extract_strided_slice %157 {offsets = [0, 0], sizes = [1, 32], strides = [1, 1]} : vector<1x128xf32> to vector<1x32xf32>
    %159 = vector.extract_strided_slice %157 {offsets = [0, 32], sizes = [1, 32], strides = [1, 1]} : vector<1x128xf32> to vector<1x32xf32>
    %160 = vector.extract_strided_slice %157 {offsets = [0, 64], sizes = [1, 32], strides = [1, 1]} : vector<1x128xf32> to vector<1x32xf32>
    %cst_39 = arith.constant 2.000000e+00 : f32
    %161 = vector.broadcast %cst_39 : f32 to vector<1x32xf32>
    %162 = arith.mulf %161, %160 : vector<1x32xf32>
    %cst_40 = arith.constant 1.000000e+00 : f32
    %163 = vector.broadcast %cst_40 : f32 to vector<1x32xf32>
    %164 = arith.subf %162, %163 : vector<1x32xf32>
    %165 = vector.extract_strided_slice %157 {offsets = [0, 96], sizes = [1, 32], strides = [1, 1]} : vector<1x128xf32> to vector<1x32xf32>
    %166 = arith.mulf %159, %123 : vector<1x32xf32>
    %167 = arith.mulf %158, %164 : vector<1x32xf32>
    %168 = arith.addf %166, %167 : vector<1x32xf32>
    %169 = math.tanh %168 : vector<1x32xf32>
    %170 = arith.mulf %165, %169 : vector<1x32xf32>
    %c2 = arith.constant 2 : index
    %c0_41 = arith.constant 0 : index
    %171 = vector.load %arg10[%c2, %c0_41] : memref<8x32xf32, #tpu.memory_space<vmem>>, vector<1x32xf32>
    tpu.vector_store %arg10[%c2, %c0_41], %170 {strides = array<i32>} : memref<8x32xf32, #tpu.memory_space<vmem>>, vector<1x32xf32>,
    %172 = tpu.concatenate %150, %170 in 1 : vector<1x32xf32>, vector<1x32xf32> -> vector<1x64xf32>
    %173 = arith.truncf %172 : vector<1x64xf32> to vector<1x64xbf16>
    %cst_42 = arith.constant dense<0.000000e+00> : vector<1x256xf32>
    %174 = tpu.matmul %173, %7, %cst_42 {dimension_numbers = #tpu.dot_dimension_numbers<[1], [0], [0], [1], [0, 0, 1, 1], [], []>} : vector<1x64xbf16>, vector<64x256xbf16>, vector<1x256xf32> -> vector<1x256xf32>
    %175 = vector.extract_strided_slice %174 {offsets = [0, 0], sizes = [1, 128], strides = [1, 1]} : vector<1x256xf32> to vector<1x128xf32>
    %176 = vector.extract_strided_slice %6 {offsets = [4, 0], sizes = [1, 128], strides = [1, 1]} : vector<8x128xf32> to vector<1x128xf32>
    %177 = arith.addf %175, %176 : vector<1x128xf32>
    %178 = arith.negf %177 : vector<1x128xf32>
    %179 = math.exp %178 : vector<1x128xf32>
    %cst_43 = arith.constant 1.000000e+00 : f32
    %180 = vector.broadcast %cst_43 : f32 to vector<1x128xf32>
    %181 = arith.addf %180, %179 : vector<1x128xf32>
    %182 = arith.divf %180, %181 : vector<1x128xf32>
    %183 = vector.extract_strided_slice %182 {offsets = [0, 0], sizes = [1, 32], strides = [1, 1]} : vector<1x128xf32> to vector<1x32xf32>
    %184 = vector.extract_strided_slice %182 {offsets = [0, 32], sizes = [1, 32], strides = [1, 1]} : vector<1x128xf32> to vector<1x32xf32>
    %185 = vector.extract_strided_slice %182 {offsets = [0, 64], sizes = [1, 32], strides = [1, 1]} : vector<1x128xf32> to vector<1x32xf32>
    %cst_44 = arith.constant 2.000000e+00 : f32
    %186 = vector.broadcast %cst_44 : f32 to vector<1x32xf32>
    %187 = arith.mulf %186, %185 : vector<1x32xf32>
    %cst_45 = arith.constant 1.000000e+00 : f32
    %188 = vector.broadcast %cst_45 : f32 to vector<1x32xf32>
    %189 = arith.subf %187, %188 : vector<1x32xf32>
    %190 = vector.extract_strided_slice %182 {offsets = [0, 96], sizes = [1, 32], strides = [1, 1]} : vector<1x128xf32> to vector<1x32xf32>
    %191 = arith.mulf %184, %148 : vector<1x32xf32>
    %192 = arith.mulf %183, %189 : vector<1x32xf32>
    %193 = arith.addf %191, %192 : vector<1x32xf32>
    %194 = math.tanh %193 : vector<1x32xf32>
    %195 = arith.mulf %190, %194 : vector<1x32xf32>
    %196 = vector.extract_strided_slice %174 {offsets = [0, 128], sizes = [1, 128], strides = [1, 1]} : vector<1x256xf32> to vector<1x128xf32>
    %197 = arith.addf %196, %8 : vector<1x128xf32>
    %198 = arith.negf %197 : vector<1x128xf32>
    %199 = math.exp %198 : vector<1x128xf32>
    %cst_46 = arith.constant 1.000000e+00 : f32
    %200 = vector.broadcast %cst_46 : f32 to vector<1x128xf32>
    %201 = arith.addf %200, %199 : vector<1x128xf32>
    %202 = arith.divf %200, %201 : vector<1x128xf32>
    %203 = vector.extract_strided_slice %202 {offsets = [0, 0], sizes = [1, 32], strides = [1, 1]} : vector<1x128xf32> to vector<1x32xf32>
    %204 = vector.extract_strided_slice %202 {offsets = [0, 32], sizes = [1, 32], strides = [1, 1]} : vector<1x128xf32> to vector<1x32xf32>
    %205 = vector.extract_strided_slice %202 {offsets = [0, 64], sizes = [1, 32], strides = [1, 1]} : vector<1x128xf32> to vector<1x32xf32>
    %cst_47 = arith.constant 2.000000e+00 : f32
    %206 = vector.broadcast %cst_47 : f32 to vector<1x32xf32>
    %207 = arith.mulf %206, %205 : vector<1x32xf32>
    %cst_48 = arith.constant 1.000000e+00 : f32
    %208 = vector.broadcast %cst_48 : f32 to vector<1x32xf32>
    %209 = arith.subf %207, %208 : vector<1x32xf32>
    %210 = vector.extract_strided_slice %202 {offsets = [0, 96], sizes = [1, 32], strides = [1, 1]} : vector<1x128xf32> to vector<1x32xf32>
    %211 = arith.mulf %204, %168 : vector<1x32xf32>
    %212 = arith.mulf %203, %209 : vector<1x32xf32>
    %213 = arith.addf %211, %212 : vector<1x32xf32>
    %214 = math.tanh %213 : vector<1x32xf32>
    %215 = arith.mulf %210, %214 : vector<1x32xf32>
    %c3 = arith.constant 3 : index
    %c0_49 = arith.constant 0 : index
    %216 = vector.load %arg10[%c3, %c0_49] : memref<8x32xf32, #tpu.memory_space<vmem>>, vector<1x32xf32>
    tpu.vector_store %arg10[%c3, %c0_49], %215 {strides = array<i32>} : memref<8x32xf32, #tpu.memory_space<vmem>>, vector<1x32xf32>,
    %217 = tpu.concatenate %195, %215 in 1 : vector<1x32xf32>, vector<1x32xf32> -> vector<1x64xf32>
    %218 = arith.truncf %217 : vector<1x64xf32> to vector<1x64xbf16>
    %cst_50 = arith.constant dense<0.000000e+00> : vector<1x256xf32>
    %219 = tpu.matmul %218, %7, %cst_50 {dimension_numbers = #tpu.dot_dimension_numbers<[1], [0], [0], [1], [0, 0, 1, 1], [], []>} : vector<1x64xbf16>, vector<64x256xbf16>, vector<1x256xf32> -> vector<1x256xf32>
    %220 = vector.extract_strided_slice %219 {offsets = [0, 0], sizes = [1, 128], strides = [1, 1]} : vector<1x256xf32> to vector<1x128xf32>
    %221 = vector.extract_strided_slice %6 {offsets = [5, 0], sizes = [1, 128], strides = [1, 1]} : vector<8x128xf32> to vector<1x128xf32>
    %222 = arith.addf %220, %221 : vector<1x128xf32>
    %223 = arith.negf %222 : vector<1x128xf32>
    %224 = math.exp %223 : vector<1x128xf32>
    %cst_51 = arith.constant 1.000000e+00 : f32
    %225 = vector.broadcast %cst_51 : f32 to vector<1x128xf32>
    %226 = arith.addf %225, %224 : vector<1x128xf32>
    %227 = arith.divf %225, %226 : vector<1x128xf32>
    %228 = vector.extract_strided_slice %227 {offsets = [0, 0], sizes = [1, 32], strides = [1, 1]} : vector<1x128xf32> to vector<1x32xf32>
    %229 = vector.extract_strided_slice %227 {offsets = [0, 32], sizes = [1, 32], strides = [1, 1]} : vector<1x128xf32> to vector<1x32xf32>
    %230 = vector.extract_strided_slice %227 {offsets = [0, 64], sizes = [1, 32], strides = [1, 1]} : vector<1x128xf32> to vector<1x32xf32>
    %cst_52 = arith.constant 2.000000e+00 : f32
    %231 = vector.broadcast %cst_52 : f32 to vector<1x32xf32>
    %232 = arith.mulf %231, %230 : vector<1x32xf32>
    %cst_53 = arith.constant 1.000000e+00 : f32
    %233 = vector.broadcast %cst_53 : f32 to vector<1x32xf32>
    %234 = arith.subf %232, %233 : vector<1x32xf32>
    %235 = vector.extract_strided_slice %227 {offsets = [0, 96], sizes = [1, 32], strides = [1, 1]} : vector<1x128xf32> to vector<1x32xf32>
    %236 = arith.mulf %229, %193 : vector<1x32xf32>
    %237 = arith.mulf %228, %234 : vector<1x32xf32>
    %238 = arith.addf %236, %237 : vector<1x32xf32>
    %239 = math.tanh %238 : vector<1x32xf32>
    %240 = arith.mulf %235, %239 : vector<1x32xf32>
    %241 = vector.extract_strided_slice %219 {offsets = [0, 128], sizes = [1, 128], strides = [1, 1]} : vector<1x256xf32> to vector<1x128xf32>
    %242 = arith.addf %241, %8 : vector<1x128xf32>
    %243 = arith.negf %242 : vector<1x128xf32>
    %244 = math.exp %243 : vector<1x128xf32>
    %cst_54 = arith.constant 1.000000e+00 : f32
    %245 = vector.broadcast %cst_54 : f32 to vector<1x128xf32>
    %246 = arith.addf %245, %244 : vector<1x128xf32>
    %247 = arith.divf %245, %246 : vector<1x128xf32>
    %248 = vector.extract_strided_slice %247 {offsets = [0, 0], sizes = [1, 32], strides = [1, 1]} : vector<1x128xf32> to vector<1x32xf32>
    %249 = vector.extract_strided_slice %247 {offsets = [0, 32], sizes = [1, 32], strides = [1, 1]} : vector<1x128xf32> to vector<1x32xf32>
    %250 = vector.extract_strided_slice %247 {offsets = [0, 64], sizes = [1, 32], strides = [1, 1]} : vector<1x128xf32> to vector<1x32xf32>
    %cst_55 = arith.constant 2.000000e+00 : f32
    %251 = vector.broadcast %cst_55 : f32 to vector<1x32xf32>
    %252 = arith.mulf %251, %250 : vector<1x32xf32>
    %cst_56 = arith.constant 1.000000e+00 : f32
    %253 = vector.broadcast %cst_56 : f32 to vector<1x32xf32>
    %254 = arith.subf %252, %253 : vector<1x32xf32>
    %255 = vector.extract_strided_slice %247 {offsets = [0, 96], sizes = [1, 32], strides = [1, 1]} : vector<1x128xf32> to vector<1x32xf32>
    %256 = arith.mulf %249, %213 : vector<1x32xf32>
    %257 = arith.mulf %248, %254 : vector<1x32xf32>
    %258 = arith.addf %256, %257 : vector<1x32xf32>
    %259 = math.tanh %258 : vector<1x32xf32>
    %260 = arith.mulf %255, %259 : vector<1x32xf32>
    %c4 = arith.constant 4 : index
    %c0_57 = arith.constant 0 : index
    %261 = vector.load %arg10[%c4, %c0_57] : memref<8x32xf32, #tpu.memory_space<vmem>>, vector<1x32xf32>
    tpu.vector_store %arg10[%c4, %c0_57], %260 {strides = array<i32>} : memref<8x32xf32, #tpu.memory_space<vmem>>, vector<1x32xf32>,
    %262 = tpu.concatenate %240, %260 in 1 : vector<1x32xf32>, vector<1x32xf32> -> vector<1x64xf32>
    %263 = arith.truncf %262 : vector<1x64xf32> to vector<1x64xbf16>
    %cst_58 = arith.constant dense<0.000000e+00> : vector<1x256xf32>
    %264 = tpu.matmul %263, %7, %cst_58 {dimension_numbers = #tpu.dot_dimension_numbers<[1], [0], [0], [1], [0, 0, 1, 1], [], []>} : vector<1x64xbf16>, vector<64x256xbf16>, vector<1x256xf32> -> vector<1x256xf32>
    %265 = vector.extract_strided_slice %264 {offsets = [0, 0], sizes = [1, 128], strides = [1, 1]} : vector<1x256xf32> to vector<1x128xf32>
    %266 = vector.extract_strided_slice %6 {offsets = [6, 0], sizes = [1, 128], strides = [1, 1]} : vector<8x128xf32> to vector<1x128xf32>
    %267 = arith.addf %265, %266 : vector<1x128xf32>
    %268 = arith.negf %267 : vector<1x128xf32>
    %269 = math.exp %268 : vector<1x128xf32>
    %cst_59 = arith.constant 1.000000e+00 : f32
    %270 = vector.broadcast %cst_59 : f32 to vector<1x128xf32>
    %271 = arith.addf %270, %269 : vector<1x128xf32>
    %272 = arith.divf %270, %271 : vector<1x128xf32>
    %273 = vector.extract_strided_slice %272 {offsets = [0, 0], sizes = [1, 32], strides = [1, 1]} : vector<1x128xf32> to vector<1x32xf32>
    %274 = vector.extract_strided_slice %272 {offsets = [0, 32], sizes = [1, 32], strides = [1, 1]} : vector<1x128xf32> to vector<1x32xf32>
    %275 = vector.extract_strided_slice %272 {offsets = [0, 64], sizes = [1, 32], strides = [1, 1]} : vector<1x128xf32> to vector<1x32xf32>
    %cst_60 = arith.constant 2.000000e+00 : f32
    %276 = vector.broadcast %cst_60 : f32 to vector<1x32xf32>
    %277 = arith.mulf %276, %275 : vector<1x32xf32>
    %cst_61 = arith.constant 1.000000e+00 : f32
    %278 = vector.broadcast %cst_61 : f32 to vector<1x32xf32>
    %279 = arith.subf %277, %278 : vector<1x32xf32>
    %280 = vector.extract_strided_slice %272 {offsets = [0, 96], sizes = [1, 32], strides = [1, 1]} : vector<1x128xf32> to vector<1x32xf32>
    %281 = arith.mulf %274, %238 : vector<1x32xf32>
    %282 = arith.mulf %273, %279 : vector<1x32xf32>
    %283 = arith.addf %281, %282 : vector<1x32xf32>
    %284 = math.tanh %283 : vector<1x32xf32>
    %285 = arith.mulf %280, %284 : vector<1x32xf32>
    %286 = vector.extract_strided_slice %264 {offsets = [0, 128], sizes = [1, 128], strides = [1, 1]} : vector<1x256xf32> to vector<1x128xf32>
    %287 = arith.addf %286, %8 : vector<1x128xf32>
    %288 = arith.negf %287 : vector<1x128xf32>
    %289 = math.exp %288 : vector<1x128xf32>
    %cst_62 = arith.constant 1.000000e+00 : f32
    %290 = vector.broadcast %cst_62 : f32 to vector<1x128xf32>
    %291 = arith.addf %290, %289 : vector<1x128xf32>
    %292 = arith.divf %290, %291 : vector<1x128xf32>
    %293 = vector.extract_strided_slice %292 {offsets = [0, 0], sizes = [1, 32], strides = [1, 1]} : vector<1x128xf32> to vector<1x32xf32>
    %294 = vector.extract_strided_slice %292 {offsets = [0, 32], sizes = [1, 32], strides = [1, 1]} : vector<1x128xf32> to vector<1x32xf32>
    %295 = vector.extract_strided_slice %292 {offsets = [0, 64], sizes = [1, 32], strides = [1, 1]} : vector<1x128xf32> to vector<1x32xf32>
    %cst_63 = arith.constant 2.000000e+00 : f32
    %296 = vector.broadcast %cst_63 : f32 to vector<1x32xf32>
    %297 = arith.mulf %296, %295 : vector<1x32xf32>
    %cst_64 = arith.constant 1.000000e+00 : f32
    %298 = vector.broadcast %cst_64 : f32 to vector<1x32xf32>
    %299 = arith.subf %297, %298 : vector<1x32xf32>
    %300 = vector.extract_strided_slice %292 {offsets = [0, 96], sizes = [1, 32], strides = [1, 1]} : vector<1x128xf32> to vector<1x32xf32>
    %301 = arith.mulf %294, %258 : vector<1x32xf32>
    %302 = arith.mulf %293, %299 : vector<1x32xf32>
    %303 = arith.addf %301, %302 : vector<1x32xf32>
    %304 = math.tanh %303 : vector<1x32xf32>
    %305 = arith.mulf %300, %304 : vector<1x32xf32>
    %c5 = arith.constant 5 : index
    %c0_65 = arith.constant 0 : index
    %306 = vector.load %arg10[%c5, %c0_65] : memref<8x32xf32, #tpu.memory_space<vmem>>, vector<1x32xf32>
    tpu.vector_store %arg10[%c5, %c0_65], %305 {strides = array<i32>} : memref<8x32xf32, #tpu.memory_space<vmem>>, vector<1x32xf32>,
    %307 = tpu.concatenate %285, %305 in 1 : vector<1x32xf32>, vector<1x32xf32> -> vector<1x64xf32>
    %308 = arith.truncf %307 : vector<1x64xf32> to vector<1x64xbf16>
    %cst_66 = arith.constant dense<0.000000e+00> : vector<1x256xf32>
    %309 = tpu.matmul %308, %7, %cst_66 {dimension_numbers = #tpu.dot_dimension_numbers<[1], [0], [0], [1], [0, 0, 1, 1], [], []>} : vector<1x64xbf16>, vector<64x256xbf16>, vector<1x256xf32> -> vector<1x256xf32>
    %310 = vector.extract_strided_slice %309 {offsets = [0, 0], sizes = [1, 128], strides = [1, 1]} : vector<1x256xf32> to vector<1x128xf32>
    %311 = vector.extract_strided_slice %6 {offsets = [7, 0], sizes = [1, 128], strides = [1, 1]} : vector<8x128xf32> to vector<1x128xf32>
    %312 = arith.addf %310, %311 : vector<1x128xf32>
    %313 = arith.negf %312 : vector<1x128xf32>
    %314 = math.exp %313 : vector<1x128xf32>
    %cst_67 = arith.constant 1.000000e+00 : f32
    %315 = vector.broadcast %cst_67 : f32 to vector<1x128xf32>
    %316 = arith.addf %315, %314 : vector<1x128xf32>
    %317 = arith.divf %315, %316 : vector<1x128xf32>
    %318 = vector.extract_strided_slice %317 {offsets = [0, 0], sizes = [1, 32], strides = [1, 1]} : vector<1x128xf32> to vector<1x32xf32>
    %319 = vector.extract_strided_slice %317 {offsets = [0, 32], sizes = [1, 32], strides = [1, 1]} : vector<1x128xf32> to vector<1x32xf32>
    %320 = vector.extract_strided_slice %317 {offsets = [0, 64], sizes = [1, 32], strides = [1, 1]} : vector<1x128xf32> to vector<1x32xf32>
    %cst_68 = arith.constant 2.000000e+00 : f32
    %321 = vector.broadcast %cst_68 : f32 to vector<1x32xf32>
    %322 = arith.mulf %321, %320 : vector<1x32xf32>
    %cst_69 = arith.constant 1.000000e+00 : f32
    %323 = vector.broadcast %cst_69 : f32 to vector<1x32xf32>
    %324 = arith.subf %322, %323 : vector<1x32xf32>
    %325 = vector.extract_strided_slice %317 {offsets = [0, 96], sizes = [1, 32], strides = [1, 1]} : vector<1x128xf32> to vector<1x32xf32>
    %326 = arith.mulf %319, %283 : vector<1x32xf32>
    %327 = arith.mulf %318, %324 : vector<1x32xf32>
    %328 = arith.addf %326, %327 : vector<1x32xf32>
    %329 = math.tanh %328 : vector<1x32xf32>
    %330 = arith.mulf %325, %329 : vector<1x32xf32>
    %331 = vector.extract_strided_slice %309 {offsets = [0, 128], sizes = [1, 128], strides = [1, 1]} : vector<1x256xf32> to vector<1x128xf32>
    %332 = arith.addf %331, %8 : vector<1x128xf32>
    %333 = arith.negf %332 : vector<1x128xf32>
    %334 = math.exp %333 : vector<1x128xf32>
    %cst_70 = arith.constant 1.000000e+00 : f32
    %335 = vector.broadcast %cst_70 : f32 to vector<1x128xf32>
    %336 = arith.addf %335, %334 : vector<1x128xf32>
    %337 = arith.divf %335, %336 : vector<1x128xf32>
    %338 = vector.extract_strided_slice %337 {offsets = [0, 0], sizes = [1, 32], strides = [1, 1]} : vector<1x128xf32> to vector<1x32xf32>
    %339 = vector.extract_strided_slice %337 {offsets = [0, 32], sizes = [1, 32], strides = [1, 1]} : vector<1x128xf32> to vector<1x32xf32>
    %340 = vector.extract_strided_slice %337 {offsets = [0, 64], sizes = [1, 32], strides = [1, 1]} : vector<1x128xf32> to vector<1x32xf32>
    %cst_71 = arith.constant 2.000000e+00 : f32
    %341 = vector.broadcast %cst_71 : f32 to vector<1x32xf32>
    %342 = arith.mulf %341, %340 : vector<1x32xf32>
    %cst_72 = arith.constant 1.000000e+00 : f32
    %343 = vector.broadcast %cst_72 : f32 to vector<1x32xf32>
    %344 = arith.subf %342, %343 : vector<1x32xf32>
    %345 = vector.extract_strided_slice %337 {offsets = [0, 96], sizes = [1, 32], strides = [1, 1]} : vector<1x128xf32> to vector<1x32xf32>
    %346 = arith.mulf %339, %303 : vector<1x32xf32>
    %347 = arith.mulf %338, %344 : vector<1x32xf32>
    %348 = arith.addf %346, %347 : vector<1x32xf32>
    %349 = math.tanh %348 : vector<1x32xf32>
    %350 = arith.mulf %345, %349 : vector<1x32xf32>
    %c6 = arith.constant 6 : index
    %c0_73 = arith.constant 0 : index
    %351 = vector.load %arg10[%c6, %c0_73] : memref<8x32xf32, #tpu.memory_space<vmem>>, vector<1x32xf32>
    tpu.vector_store %arg10[%c6, %c0_73], %350 {strides = array<i32>} : memref<8x32xf32, #tpu.memory_space<vmem>>, vector<1x32xf32>,
    %352 = tpu.concatenate %330, %350 in 1 : vector<1x32xf32>, vector<1x32xf32> -> vector<1x64xf32>
    %353 = arith.truncf %352 : vector<1x64xf32> to vector<1x64xbf16>
    %cst_74 = arith.constant dense<0.000000e+00> : vector<1x256xf32>
    %354 = tpu.matmul %353, %7, %cst_74 {dimension_numbers = #tpu.dot_dimension_numbers<[1], [0], [0], [1], [0, 0, 1, 1], [], []>} : vector<1x64xbf16>, vector<64x256xbf16>, vector<1x256xf32> -> vector<1x256xf32>
    %355 = vector.extract_strided_slice %354 {offsets = [0, 128], sizes = [1, 128], strides = [1, 1]} : vector<1x256xf32> to vector<1x128xf32>
    %356 = arith.addf %355, %8 : vector<1x128xf32>
    %357 = arith.negf %356 : vector<1x128xf32>
    %358 = math.exp %357 : vector<1x128xf32>
    %cst_75 = arith.constant 1.000000e+00 : f32
    %359 = vector.broadcast %cst_75 : f32 to vector<1x128xf32>
    %360 = arith.addf %359, %358 : vector<1x128xf32>
    %361 = arith.divf %359, %360 : vector<1x128xf32>
    %362 = vector.extract_strided_slice %361 {offsets = [0, 0], sizes = [1, 32], strides = [1, 1]} : vector<1x128xf32> to vector<1x32xf32>
    %363 = vector.extract_strided_slice %361 {offsets = [0, 32], sizes = [1, 32], strides = [1, 1]} : vector<1x128xf32> to vector<1x32xf32>
    %364 = vector.extract_strided_slice %361 {offsets = [0, 64], sizes = [1, 32], strides = [1, 1]} : vector<1x128xf32> to vector<1x32xf32>
    %cst_76 = arith.constant 2.000000e+00 : f32
    %365 = vector.broadcast %cst_76 : f32 to vector<1x32xf32>
    %366 = arith.mulf %365, %364 : vector<1x32xf32>
    %cst_77 = arith.constant 1.000000e+00 : f32
    %367 = vector.broadcast %cst_77 : f32 to vector<1x32xf32>
    %368 = arith.subf %366, %367 : vector<1x32xf32>
    %369 = vector.extract_strided_slice %361 {offsets = [0, 96], sizes = [1, 32], strides = [1, 1]} : vector<1x128xf32> to vector<1x32xf32>
    %370 = arith.mulf %363, %348 : vector<1x32xf32>
    %371 = arith.mulf %362, %368 : vector<1x32xf32>
    %372 = arith.addf %370, %371 : vector<1x32xf32>
    %373 = math.tanh %372 : vector<1x32xf32>
    %374 = arith.mulf %369, %373 : vector<1x32xf32>
    %c7 = arith.constant 7 : index
    %c0_78 = arith.constant 0 : index
    %375 = vector.load %arg10[%c7, %c0_78] : memref<8x32xf32, #tpu.memory_space<vmem>>, vector<1x32xf32>
    tpu.vector_store %arg10[%c7, %c0_78], %374 {strides = array<i32>} : memref<8x32xf32, #tpu.memory_space<vmem>>, vector<1x32xf32>,
    %c0_79 = arith.constant 0 : index
    %c0_80 = arith.constant 0 : index
    %376 = vector.load %arg5[%c0_79, %c0_80] : memref<32x32xbf16, #tpu.memory_space<vmem>>, vector<32x32xbf16>
    %c0_81 = arith.constant 0 : index
    %c0_82 = arith.constant 0 : index
    %377 = vector.load %arg6[%c0_81, %c0_82] : memref<1x32xf32, #tpu.memory_space<vmem>>, vector<1x32xf32>
    %c0_83 = arith.constant 0 : index
    %c0_84 = arith.constant 0 : index
    %378 = vector.load %arg10[%c0_83, %c0_84] : memref<8x32xf32, #tpu.memory_space<vmem>>, vector<8x32xf32>
    %379 = arith.truncf %378 : vector<8x32xf32> to vector<8x32xbf16>
    %cst_85 = arith.constant dense<0.000000e+00> : vector<8x32xf32>
    %380 = tpu.matmul %379, %376, %cst_85 {dimension_numbers = #tpu.dot_dimension_numbers<[1], [0], [0], [1], [0, 0, 1, 1], [], []>} : vector<8x32xbf16>, vector<32x32xbf16>, vector<8x32xf32> -> vector<8x32xf32>
    %381 = vector.broadcast %377 : vector<1x32xf32> to vector<8x32xf32>
    %382 = arith.addf %380, %381 : vector<8x32xf32>
    %cst_86 = arith.constant 0.000000e+00 : f32
    %383 = vector.broadcast %cst_86 : f32 to vector<8x32xf32>
    %384 = arith.maximumf %382, %383 : vector<8x32xf32>
    %385 = arith.truncf %384 : vector<8x32xf32> to vector<8x32xbf16>
    %cst_87 = arith.constant dense<0.000000e+00> : vector<8x32xf32>
    %386 = tpu.matmul %385, %376, %cst_87 {dimension_numbers = #tpu.dot_dimension_numbers<[1], [0], [0], [1], [0, 0, 1, 1], [], []>} : vector<8x32xbf16>, vector<32x32xbf16>, vector<8x32xf32> -> vector<8x32xf32>
    %387 = vector.broadcast %377 : vector<1x32xf32> to vector<8x32xf32>
    %388 = arith.addf %386, %387 : vector<8x32xf32>
    %cst_88 = arith.constant 0.000000e+00 : f32
    %389 = vector.broadcast %cst_88 : f32 to vector<8x32xf32>
    %390 = arith.maximumf %388, %389 : vector<8x32xf32>
    %391 = arith.truncf %390 : vector<8x32xf32> to vector<8x32xbf16>
    %c0_89 = arith.constant 0 : index
    %c0_90 = arith.constant 0 : index
    %392 = vector.load %arg7[%c0_89, %c0_90] : memref<32x3xbf16, #tpu.memory_space<vmem>>, vector<32x3xbf16>
    %cst_91 = arith.constant dense<0.000000e+00> : vector<8x3xf32>
    %393 = tpu.matmul %391, %392, %cst_91 {dimension_numbers = #tpu.dot_dimension_numbers<[1], [0], [0], [1], [0, 0, 1, 1], [], []>} : vector<8x32xbf16>, vector<32x3xbf16>, vector<8x3xf32> -> vector<8x3xf32>
    %c0_92 = arith.constant 0 : index
    %c0_93 = arith.constant 0 : index
    %394 = vector.load %arg8[%c0_92, %c0_93] : memref<1x3xf32, #tpu.memory_space<vmem>>, vector<1x3xf32>
    %395 = vector.broadcast %394 : vector<1x3xf32> to vector<8x3xf32>
    %396 = arith.addf %393, %395 : vector<8x3xf32>
    %c0_94 = arith.constant 0 : index
    %c0_95 = arith.constant 0 : index
    %397 = vector.load %arg9[%c0_94, %c0_95] : memref<8x3xf32, #tpu.memory_space<vmem>>, vector<8x3xf32>
    tpu.vector_store %arg9[%c0_94, %c0_95], %396 {strides = array<i32>} : memref<8x3xf32, #tpu.memory_space<vmem>>, vector<8x3xf32>,
    return
  }
}

</mosaic_0001>

<bundles_post_ra>
// kernel: tpu_custom_call.1
= control target key start
LH: loop header
LB: loop body
LE: loop exit
PB: predicated region body
PF: predicated region fallthrough
CT: control target
= control target key end

     0   :  { %14 = vsyncpa [#allocation4], 0  ;;  %s1944_s0 = inlined_call_operand.vmem [shape: f32[8,13], index: 0, kind: input, shape index: {}]   ;;  %s1945_s1 = inlined_call_operand.vmem [shape: bf16[13,128], index: 1, kind: input, shape index: {}]   ;;  %s1946_s2 = inlined_call_operand.vmem [shape: f32[1,128], index: 2, kind: input, shape index: {}]   ;;  %s1947_s3 = inlined_call_operand.hbm [shape: bf16[64,256], index: 3, kind: input, shape index: {}]   ;;  %s1948_s4 = inlined_call_operand.hbm [shape: f32[1,128], index: 4, kind: input, shape index: {}]   ;;  %s1949_s5 = inlined_call_operand.vmem [shape: bf16[32,32], index: 5, kind: input, shape index: {}]   ;;  %s1950_s6 = inlined_call_operand.vmem [shape: f32[1,32], index: 6, kind: input, shape index: {}]   ;;  %s1951_s7 = inlined_call_operand.vmem [shape: bf16[32,3], index: 7, kind: input, shape index: {}]   ;;  %s1952_s8 = inlined_call_operand.vmem [shape: f32[1,3], index: 8, kind: input, shape index: {}]   ;;  %s1953_s9 = inlined_call_operand.vmem [shape: f32[8,3], index: 9, kind: output, shape index: {}]  }
   0x1   :  { %15 = vsyncpa [#allocation6], 0  ;;  %s1575_s30 = smov [#allocation3]   ;;  %s1527_s13 = scalar_lea.hbm %s1947_s3, 1024 }
   0x2   :  { %s27_s10 = sshll.u32 %s1575_s30, 4  ;;  %p1528_p0 = scmp.ne.s32.totalorder %s1947_s3, %s1527_s13  ;;  %s28_s10 = int_to_ptr.vmem [resolvable:$true] %s27_s10 }
   0x3   :  { %p1531_p1 = scmp.lt.u32.totalorder %s1527_s13, %s1947_s3 }
   0x5   :  { %p1533_p2 = pnand %p1531_p1, %p1528_p0 }
   0x7   :  { %1536 = shalt.err (!%p1533_p2)
}
   0x8   :  { %s1537_s18 = scalar_lea.vmem %s28_s10, 1024  ;;  %p1542_p4 = scmp.lt.s32.totalorder %s28_s10, %s28_s10 }
   0x9   :  { %p1538_p3 = scmp.ne.s32.totalorder %s28_s10, %s1537_s18  ;;  %p1543_p5 = scmp.lt.s32.totalorder %s1537_s18, %s1537_s18 }
   0xb   :  { %p1544_p6 = por %p1543_p5, %p1542_p4 }
   0xd   :  { %p1545_p7 = pnand %p1544_p6, %p1538_p3 }
   0xf   :  { %1548 = shalt.err (!%p1545_p7)
}
  0x10   :  { %s1576_s19 = smov 128   ;;  %s1577_s20 = smov 8  }
  0x11   :  { %33 = dma.hbm_to_vmem [thread:$0]  %s1947_s3, 1024, %s28_s10, [#allocation4], %s1576_s19, %s1576_s19, %s1577_s20  }
  0x12   :  { %s1578_s23 = smov [#allocation5]   ;;  %s1549_s27 = scalar_lea.hbm %s1948_s4, 16 }
  0x13   :  { %s40_s24 = sshll.u32 %s1578_s23, 4  ;;  %p1550_p8 = scmp.ne.s32.totalorder %s1948_s4, %s1549_s27  ;;  %s41_s24 = int_to_ptr.vmem [resolvable:$true] %s40_s24 }
  0x14   :  { %p1553_p9 = scmp.lt.u32.totalorder %s1549_s27, %s1948_s4 }
  0x16   :  { %p1555_p10 = pnand %p1553_p9, %p1550_p8 }
  0x18   :  { %1558 = shalt.err (!%p1555_p10)
}
  0x19   :  { %s1559_s12 = scalar_lea.vmem %s41_s24, 16  ;;  %s1563_s3 = scalar_lea.vmem %s41_s24, 32 }
  0x1a   :  { %p1560_p11 = scmp.ne.s32.totalorder %s41_s24, %s1559_s12  ;;  %p1564_p12 = scmp.lt.s32.totalorder %s41_s24, %s41_s24 }
  0x1b   :  { %p1565_p13 = scmp.lt.s32.totalorder %s1563_s3, %s1559_s12 }
  0x1d   :  { %p1566_p0 = por %p1565_p13, %p1564_p12 }
  0x1f   :  { %p1567_p1 = pnand %p1566_p0, %p1560_p11 }
  0x21   :  { %1570 = shalt.err (!%p1567_p1)
}
  0x22   :  { %43 = dma.hbm_to_vmem [thread:$0]  %s1948_s4, 16, %s41_s24, [#allocation6]  }
  0x23   :  { %1571 = dma.done.wait [#allocation4], 1024  }
  0x24   :  { %1572 = vsyncadd [#allocation4], 4294966272 }
  0x25   :  { %1573 = dma.done.wait [#allocation6], 16  }
  0x26   :  { %1574 = vsyncadd [#allocation6], 4294967280  ;;  %v1579_v0 = vmov 0.0   ;;  %vm79_vm0 = vcmask 1045504   ;;  %vm1580_vm1 = vmmov 0   ;;  %v1581_v1 = vmov 0  }
  0x27   :  { %1373 = vmatprep.subr.bf16.mxu0 %v1579_v0  ;;  %1375 = vmatprep.mubr.msk.bf16.mxu0 %vm1580_vm1, %v1579_v0  ;;  %vm80_vm2 = vcmask 1046528   ;;  %v1582_v2 = vmov 65535   ;;  %v1664_v4 = vld [vmem:[#allocation3 + $0x4] ss:$8 sps:$4 sm:$0xff]   ;;  %v1666_v5 = vld [vmem:[#allocation3] ss:$8 sps:$4 sm:$0xff]  }
  0x28   :  { %212 = vmatprep.mubr.bf16.mxu1 %v1581_v1  ;;  %v81_v3 = vsel %vm79_vm0, 4294967295, %v1582_v2  ;;  %180 = vmatprep.subr.bf16.mxu1 %v1664_v4  ;;  %v1669_v7 = vld [vmem:[#allocation3 + $0x14] ss:$8 sps:$4 sm:$0xff]   ;;  %v1671_v8 = vld [vmem:[#allocation3 + $0x10] ss:$8 sps:$4 sm:$0xff]   ;;  %vm75_vm3 = vcmask 105472  }
  0x29   :  { %v82_v6 = vsel %vm80_vm2, %v81_v3, 0  ;;  %181 = vmatpush1.bf16.msra.mxu1 %v1666_v5  ;;  %v1420_v9 = vld [vmem:[%s1945_s1] sm:$0x7f]   ;;  %v1678_v10 = vld [vmem:[#allocation3 + $0x24] ss:$8 sps:$4 sm:$0xff]   ;;  %v1583_v17 = vmov 0.0|0.0  }
  0x2a   :  { %182 = vmatprep.subr.bf16.mxu1 %v1669_v7  ;;  %v84_v11 = vand.u32 %v1420_v9, %v82_v6  ;;  %v59_v12 = vld [vmem:[%s1944_s0] sm:$0xff]  ;;  %v1683_v13 = vld [vmem:[#allocation3 + $0x20] ss:$8 sps:$4 sm:$0xff]   ;;  %s1584_s17 = smov 64   ;;  %vm250_vm4 = vcmask 261120   ;;  %vm176_vm5 = vcmask 523264  }
  0x2b   :  { %v60_v14 = vpack.c.bf16 %v59_v12, %v59_v12  ;;  %v1685_v15 = vld [vmem:[#allocation3 + $0x34] ss:$8 sps:$4 sm:$0xff]   ;;  %v1691_v16 = vld [vmem:[#allocation3 + $0x30] ss:$8 sps:$4 sm:$0xff]   ;;  %v1736_v47 = vld [vmem:[#allocation5] sm:$0x1] }
  0x2c   :  { %1374 = vmatpush3.bf16.msra.mxu0 %v84_v11  ;;  %v1302_v20 = vld [vmem:[%s1946_s2] ss:$0 sm:$0xff]  ;;  %s1585_s2 = smov 32   ;;  %vm356_vm6 = vcmask 253952   ;;  %vm1294_vm7 = vcmask 23552  }
  0x2d   :  { %183 = vmatpush1.bf16.msra.mxu1 %v1671_v8  ;;  %256 = vmatprep.subr.bf16.mxu0 %v1664_v4 }
  0x2e   :  { %184 = vmatprep.subr.bf16.mxu1 %v1678_v10 }
  0x2f   :  { %1376 = vmatmul.mubr.msk.bf16.vlgmr.msra.gmra.mrb[0].mxu0 %vm75_vm3, %v60_v14 }
  0x30   :  { %257 = vmatpush1.bf16.msra.mxu0 %v1666_v5  ;;  %288 = vmatprep.mubr.bf16.mxu0 %v1581_v1 }
  0x31   :  { %185 = vmatpush1.bf16.msra.mxu1 %v1683_v13  ;;  %258 = vmatprep.subr.bf16.mxu0 %v1669_v7 }
  0x32   :  { %186 = vmatprep.subr.bf16.mxu1 %v1685_v15 }
  0x34   :  { %259 = vmatpush1.bf16.msra.mxu0 %v1671_v8 }
  0x35   :  { %187 = vmatpush1.bf16.msra.mxu1 %v1691_v16  ;;  %260 = vmatprep.subr.bf16.mxu0 %v1678_v10 }
  0x36   :  { %370 = vmatprep.subr.bf16.mxu1 %v1664_v4 }
  0x38   :  { %213 = vmatmul.mubr.bf16.vlgmr.msra.gmra.mrb[0].mxu1 %v1583_v17  ;;  %261 = vmatpush1.bf16.msra.mxu0 %v1683_v13 }
  0x39   :  { %371 = vmatpush1.bf16.msra.mxu1 %v1666_v5  ;;  %262 = vmatprep.subr.bf16.mxu0 %v1685_v15 }
  0x3a   :  { %372 = vmatprep.subr.bf16.mxu1 %v1669_v7  ;;  %402 = vmatprep.mubr.bf16.mxu1 %v1581_v1 }
  0x3c   :  { %263 = vmatpush1.bf16.msra.mxu0 %v1691_v16 }
  0x3d   :  { %373 = vmatpush1.bf16.msra.mxu1 %v1671_v8  ;;  %482 = vmatprep.subr.bf16.mxu0 %v1664_v4 }
  0x3e   :  { %374 = vmatprep.subr.bf16.mxu1 %v1678_v10 }
  0x41   :  { %375 = vmatpush1.bf16.msra.mxu1 %v1683_v13 }
  0x42   :  { %376 = vmatprep.subr.bf16.mxu1 %v1685_v15 }
  0x45   :  { %377 = vmatpush1.bf16.msra.mxu1 %v1691_v16 }
  0x46   :  { %594 = vmatprep.subr.bf16.mxu1 %v1664_v4 }
 0x102   :  { %v120_v18 = vpop.f32.mrb[0].mxu0 }
 0x103   :  { %v1377_v19 = vpop.f32.mrb[1].mxu0  ;;  %v1717_v23 = vadd.f32 %v1302_v20, %v120_v18 }
 0x104   :  { %v123_v21 = vpop.f32.mrb[2].mxu0 }
 0x105   :  { %v1378_v22 = vpop.f32.mrb[3].mxu0  ;;  %v298_v46 = vrot.slane %v1717_v23, 1 }
 0x10b   :  { %v214_v24 = vpop.f32.mrb[0].mxu1 }
 0x10c   :  { %v220_v25 = vadd.f32 %v214_v24, %v1717_v23  ;;  %v216_v26 = vpop.f32.mrb[1].mxu1 }
 0x10d   :  { %v217_v27 = vpop.f32.mrb[2].mxu1 }
 0x10e   :  { %v1313_v28 = vmul.f32 -1.442695, %v220_v25  ;;  %v218_v29 = vpop.f32.mrb[3].mxu1 }
 0x110   :  { %1431 = vpow2.f32 %v1313_v28 }
 0x11a   :  { %v1432_v30 = vpop.eup %1431 }
 0x11b   :  { %v224_v31 = vadd.f32 1.0, %v1432_v30 }
 0x11d   :  { %1433 = vrcp.f32 %v224_v31 }
 0x127   :  { %v1434_v32 = vpop.eup %1433 }
 0x128   :  { %v227_v33 = vmul.f32 2.0, %v1434_v32  ;;  %v229_v37 = vmul.f32 0.0, %v1434_v32 }
 0x12a   :  { %v1314_v34 = vadd.f32 -1.0, %v227_v33  ;;  %v411_v33 = vrot.slane %v1717_v23, 2 }
 0x12c   :  { %231 = vrot.lane.b32.xlu0 %v1314_v34, %s1584_s17 }
 0x19e   :  { %v232_v35 = vpop.permute.xlu0 %231 }
 0x19f   :  { %v234_v36 = vmul.f32 %v1434_v32, %v232_v35 }
 0x1a1   :  { %236 = vrot.lane.b32.xlu0 %v234_v36, %s1585_s2 }
 0x213   :  { %v237_v38 = vpop.permute.xlu0 %236 }
 0x214   :  { %v239_v39 = vadd.f32 %v237_v38, %v229_v37 }
 0x216   :  { %1435 = vtanh.f32 %v239_v39 }
 0x220   :  { %v1436_v40 = vpop.eup %1435 }
 0x221   :  { %242 = vrot.lane.b32.xlu1 %v1436_v40, %s1584_s17 }
 0x293   :  { %v243_v41 = vpop.permute.xlu1 %242 }
 0x294   :  { %v245_v42 = vmul.f32 %v1434_v32, %v243_v41 }
 0x296   :  { %247 = vrot.lane.b32.xlu1 %v245_v42, %s1585_s2 }
 0x308   :  { %v248_v43 = vpop.permute.xlu1 %247 }
 0x309   :  { %v251_v44 = vsel %vm250_vm4, %v248_v43, 0.0 }
 0x30a   :  { %v252_v45 = vpack.c.bf16 %v251_v44, %v251_v44 }
 0x30c   :  { %1315 = vmatmul.mubr.msk.bf16.vlgmr.msra.gmra.mrb[4].mxu0 %vm176_vm5, %v252_v45 }
 0x30d   :  { %483 = vmatpush1.bf16.msra.mxu0 %v1666_v5  ;;  %514 = vmatprep.mubr.bf16.mxu0 %v1581_v1 }
 0x30e   :  { %484 = vmatprep.subr.bf16.mxu0 %v1669_v7 }
 0x311   :  { %485 = vmatpush1.bf16.msra.mxu0 %v1671_v8 }
 0x312   :  { %486 = vmatprep.subr.bf16.mxu0 %v1678_v10 }
 0x315   :  { %487 = vmatpush1.bf16.msra.mxu0 %v1683_v13 }
 0x316   :  { %488 = vmatprep.subr.bf16.mxu0 %v1685_v15 }
 0x319   :  { %489 = vmatpush1.bf16.msra.mxu0 %v1691_v16 }
 0x31a   :  { %706 = vmatprep.subr.bf16.mxu0 %v1664_v4 }
 0x3df   :  { %v290_v48 = vpop.f32.mrb[4].mxu0 }
 0x3e0   :  { %v300_v49 = vadd.f32 %v298_v46, %v290_v48  ;;  %v292_v50 = vpop.f32.mrb[5].mxu0 }
 0x3e1   :  { %v326_v51 = vadd.f32 %v292_v50, %v1736_v47  ;;  %v294_v52 = vpop.f32.mrb[6].mxu0 }
 0x3e2   :  { %v1316_v53 = vmul.f32 -1.442695, %v300_v49  ;;  %v295_v54 = vpop.f32.mrb[7].mxu0 }
 0x3e3   :  { %v1318_v55 = vmul.f32 -1.442695, %v326_v51 }
 0x3e4   :  { %1437 = vpow2.f32 %v1316_v53 }
 0x3e5   :  { %1439 = vpow2.f32 %v1318_v55 }
 0x3ee   :  { %v1438_v56 = vpop.eup %1437 }
 0x3ef   :  { %v1440_v57 = vpop.eup %1439  ;;  %v304_v58 = vadd.f32 1.0, %v1438_v56 }
 0x3f0   :  { %v330_v59 = vadd.f32 1.0, %v1440_v57 }
 0x3f1   :  { %1441 = vrcp.f32 %v304_v58 }
 0x3f2   :  { %1443 = vrcp.f32 %v330_v59 }
 0x3fb   :  { %v1442_v60 = vpop.eup %1441 }
 0x3fc   :  { %v1444_v61 = vpop.eup %1443  ;;  %v307_v62 = vmul.f32 2.0, %v1442_v60  ;;  %v309_v14 = vmul.f32 %v1442_v60, %v239_v39 }
 0x3fd   :  { %v333_v63 = vmul.f32 2.0, %v1444_v61  ;;  %v335_v18 = vmul.f32 0.0, %v1444_v61 }
 0x3fe   :  { %v1317_v2 = vadd.f32 -1.0, %v307_v62 }
 0x3ff   :  { %v1319_v3 = vadd.f32 -1.0, %v333_v63 }
 0x400   :  { %311 = vrot.lane.b32.xlu0 %v1317_v2, %s1584_s17 }
 0x401   :  { %337 = vrot.lane.b32.xlu1 %v1319_v3, %s1584_s17 }
 0x472   :  { %v312_v6 = vpop.permute.xlu0 %311 }
 0x473   :  { %v314_v9 = vmul.f32 %v1442_v60, %v312_v6  ;;  %v338_v11 = vpop.permute.xlu1 %337 }
 0x474   :  { %v340_v12 = vmul.f32 %v1444_v61, %v338_v11 }
 0x475   :  { %316 = vrot.lane.b32.xlu0 %v314_v9, %s1585_s2 }
 0x476   :  { %342 = vrot.lane.b32.xlu1 %v340_v12, %s1585_s2 }
 0x4e7   :  { %v317_v17 = vpop.permute.xlu0 %316 }
 0x4e8   :  { %v319_v19 = vadd.f32 %v317_v17, %v309_v14  ;;  %v343_v20 = vpop.permute.xlu1 %342 }
 0x4e9   :  { %v345_v21 = vadd.f32 %v343_v20, %v335_v18 }
 0x4ea   :  { %1445 = vtanh.f32 %v319_v19 }
 0x4eb   :  { %1447 = vtanh.f32 %v345_v21 }
 0x4f4   :  { %v1446_v22 = vpop.eup %1445 }
 0x4f5   :  { %v1448_v24 = vpop.eup %1447  ;;  %322 = vrot.lane.b32.xlu0 %v1446_v22, %s1584_s17 }
 0x4f6   :  { %348 = vrot.lane.b32.xlu1 %v1448_v24, %s1584_s17 }
 0x567   :  { %v323_v25 = vpop.permute.xlu0 %322 }
 0x568   :  { %v325_v26 = vmul.f32 %v1442_v60, %v323_v25  ;;  %v349_v27 = vpop.permute.xlu1 %348 }
 0x569   :  { %v1745_v28 = vmul.f32 %v1444_v61, %v349_v27 }
 0x56a   :  { %359 = vrot.lane.b32.xlu0 %v325_v26, %s1585_s2 }
 0x56b   :  { %362 = vrot.lane.b32.xlu1 %v1745_v28, %s1584_s17 }
 0x5dc   :  { %v360_v29 = vpop.permute.xlu0 %359 }
 0x5dd   :  { %v363_v30 = vpop.permute.xlu1 %362 }
 0x5de   :  { %v365_v31 = vsel %vm250_vm4, %v360_v29, %v363_v30 }
 0x5df   :  { %v366_v32 = vpack.c.bf16 %v365_v31, %v365_v31 }
 0x5e1   :  { %1320 = vmatmul.mubr.msk.bf16.vlgmr.msra.gmra.mrb[4].mxu1 %vm176_vm5, %v366_v32 }
 0x5e2   :  { %595 = vmatpush1.bf16.msra.mxu1 %v1666_v5  ;;  %626 = vmatprep.mubr.bf16.mxu1 %v1581_v1 }
 0x5e3   :  { %596 = vmatprep.subr.bf16.mxu1 %v1669_v7 }
 0x5e6   :  { %597 = vmatpush1.bf16.msra.mxu1 %v1671_v8 }
 0x5e7   :  { %598 = vmatprep.subr.bf16.mxu1 %v1678_v10 }
 0x5ea   :  { %599 = vmatpush1.bf16.msra.mxu1 %v1683_v13 }
 0x5eb   :  { %600 = vmatprep.subr.bf16.mxu1 %v1685_v15 }
 0x5ee   :  { %601 = vmatpush1.bf16.msra.mxu1 %v1691_v16 }
 0x5ef   :  { %818 = vmatprep.subr.bf16.mxu1 %v1664_v4 }
 0x6b4   :  { %v404_v34 = vpop.f32.mrb[4].mxu1 }
 0x6b5   :  { %v413_v35 = vadd.f32 %v411_v33, %v404_v34  ;;  %v406_v36 = vpop.f32.mrb[5].mxu1 }
 0x6b6   :  { %v439_v37 = vadd.f32 %v406_v36, %v1736_v47  ;;  %v408_v38 = vpop.f32.mrb[6].mxu1 }
 0x6b7   :  { %v1321_v39 = vmul.f32 -1.442695, %v413_v35  ;;  %v409_v40 = vpop.f32.mrb[7].mxu1 }
 0x6b8   :  { %v1323_v41 = vmul.f32 -1.442695, %v439_v37 }
 0x6b9   :  { %1449 = vpow2.f32 %v1321_v39 }
 0x6ba   :  { %1451 = vpow2.f32 %v1323_v41 }
 0x6c3   :  { %v1450_v42 = vpop.eup %1449 }
 0x6c4   :  { %v1452_v43 = vpop.eup %1451  ;;  %v417_v44 = vadd.f32 1.0, %v1450_v42 }
 0x6c5   :  { %v443_v45 = vadd.f32 1.0, %v1452_v43 }
 0x6c6   :  { %1453 = vrcp.f32 %v417_v44 }
 0x6c7   :  { %1455 = vrcp.f32 %v443_v45 }
 0x6d0   :  { %v1454_v46 = vpop.eup %1453 }
 0x6d1   :  { %v1456_v48 = vpop.eup %1455  ;;  %v420_v49 = vmul.f32 2.0, %v1454_v46  ;;  %v422_v57 = vmul.f32 %v1454_v46, %v319_v19  ;;  %v523_v19 = vrot.slane %v1717_v23, 3 }
 0x6d2   :  { %v446_v50 = vmul.f32 2.0, %v1456_v48  ;;  %v448_v59 = vmul.f32 %v1456_v48, %v345_v21 }
 0x6d3   :  { %v1322_v51 = vadd.f32 -1.0, %v420_v49 }
 0x6d4   :  { %v1324_v52 = vadd.f32 -1.0, %v446_v50 }
 0x6d5   :  { %424 = vrot.lane.b32.xlu0 %v1322_v51, %s1584_s17 }
 0x6d6   :  { %450 = vrot.lane.b32.xlu1 %v1324_v52, %s1584_s17 }
 0x747   :  { %v425_v53 = vpop.permute.xlu0 %424 }
 0x748   :  { %v427_v54 = vmul.f32 %v1454_v46, %v425_v53  ;;  %v451_v55 = vpop.permute.xlu1 %450 }
 0x749   :  { %v453_v56 = vmul.f32 %v1456_v48, %v451_v55 }
 0x74a   :  { %429 = vrot.lane.b32.xlu0 %v427_v54, %s1585_s2 }
 0x74b   :  { %455 = vrot.lane.b32.xlu1 %v453_v56, %s1585_s2 }
 0x7bc   :  { %v430_v58 = vpop.permute.xlu0 %429 }
 0x7bd   :  { %v432_v60 = vadd.f32 %v430_v58, %v422_v57  ;;  %v456_v61 = vpop.permute.xlu1 %455 }
 0x7be   :  { %v458_v62 = vadd.f32 %v456_v61, %v448_v59  ;;  %v635_v61 = vrot.slane %v1717_v23, 4 }
 0x7bf   :  { %1457 = vtanh.f32 %v432_v60 }
 0x7c0   :  { %1459 = vtanh.f32 %v458_v62 }
 0x7c9   :  { %v1458_v63 = vpop.eup %1457 }
 0x7ca   :  { %v1460_v2 = vpop.eup %1459  ;;  %435 = vrot.lane.b32.xlu0 %v1458_v63, %s1584_s17 }
 0x7cb   :  { %461 = vrot.lane.b32.xlu1 %v1460_v2, %s1584_s17 }
 0x83c   :  { %v436_v3 = vpop.permute.xlu0 %435 }
 0x83d   :  { %v438_v6 = vmul.f32 %v1454_v46, %v436_v3  ;;  %v462_v9 = vpop.permute.xlu1 %461 }
 0x83e   :  { %v1769_v11 = vmul.f32 %v1456_v48, %v462_v9 }
 0x83f   :  { %471 = vrot.lane.b32.xlu0 %v438_v6, %s1585_s2 }
 0x840   :  { %474 = vrot.lane.b32.xlu1 %v1769_v11, %s1584_s17 }
 0x8b1   :  { %v472_v12 = vpop.permute.xlu0 %471 }
 0x8b2   :  { %v475_v14 = vpop.permute.xlu1 %474 }
 0x8b3   :  { %v477_v17 = vsel %vm250_vm4, %v472_v12, %v475_v14 }
 0x8b4   :  { %v478_v18 = vpack.c.bf16 %v477_v17, %v477_v17 }
 0x8b6   :  { %1325 = vmatmul.mubr.msk.bf16.vlgmr.msra.gmra.mrb[8].mxu0 %vm176_vm5, %v478_v18 }
 0x8b7   :  { %707 = vmatpush1.bf16.msra.mxu0 %v1666_v5  ;;  %738 = vmatprep.mubr.bf16.mxu0 %v1581_v1 }
 0x8b8   :  { %708 = vmatprep.subr.bf16.mxu0 %v1669_v7 }
 0x8bb   :  { %709 = vmatpush1.bf16.msra.mxu0 %v1671_v8 }
 0x8bc   :  { %710 = vmatprep.subr.bf16.mxu0 %v1678_v10 }
 0x8bf   :  { %711 = vmatpush1.bf16.msra.mxu0 %v1683_v13 }
 0x8c0   :  { %712 = vmatprep.subr.bf16.mxu0 %v1685_v15 }
 0x8c3   :  { %713 = vmatpush1.bf16.msra.mxu0 %v1691_v16 }
 0x8c4   :  { %930 = vmatprep.subr.bf16.mxu0 %v1664_v4 }
 0x989   :  { %v516_v20 = vpop.f32.mrb[8].mxu0 }
 0x98a   :  { %v525_v21 = vadd.f32 %v523_v19, %v516_v20  ;;  %v518_v22 = vpop.f32.mrb[9].mxu0 }
 0x98b   :  { %v551_v24 = vadd.f32 %v518_v22, %v1736_v47  ;;  %v520_v25 = vpop.f32.mrb[10].mxu0 }
 0x98c   :  { %v1326_v26 = vmul.f32 -1.442695, %v525_v21  ;;  %v521_v27 = vpop.f32.mrb[11].mxu0 }
 0x98d   :  { %v1328_v29 = vmul.f32 -1.442695, %v551_v24 }
 0x98e   :  { %1461 = vpow2.f32 %v1326_v26 }
 0x98f   :  { %1463 = vpow2.f32 %v1328_v29 }
 0x998   :  { %v1462_v30 = vpop.eup %1461 }
 0x999   :  { %v1464_v31 = vpop.eup %1463  ;;  %v529_v32 = vadd.f32 1.0, %v1462_v30 }
 0x99a   :  { %v555_v33 = vadd.f32 1.0, %v1464_v31 }
 0x99b   :  { %1465 = vrcp.f32 %v529_v32 }
 0x99c   :  { %1467 = vrcp.f32 %v555_v33 }
 0x9a5   :  { %v1466_v34 = vpop.eup %1465 }
 0x9a6   :  { %v1468_v35 = vpop.eup %1467  ;;  %v532_v36 = vmul.f32 2.0, %v1466_v34  ;;  %v534_v44 = vmul.f32 %v1466_v34, %v432_v60 }
 0x9a7   :  { %v558_v37 = vmul.f32 2.0, %v1468_v35  ;;  %v560_v46 = vmul.f32 %v1468_v35, %v458_v62 }
 0x9a8   :  { %v1327_v38 = vadd.f32 -1.0, %v532_v36 }
 0x9a9   :  { %v1329_v39 = vadd.f32 -1.0, %v558_v37 }
 0x9aa   :  { %536 = vrot.lane.b32.xlu0 %v1327_v38, %s1584_s17 }
 0x9ab   :  { %562 = vrot.lane.b32.xlu1 %v1329_v39, %s1584_s17 }
 0xa1c   :  { %v537_v40 = vpop.permute.xlu0 %536 }
 0xa1d   :  { %v539_v41 = vmul.f32 %v1466_v34, %v537_v40  ;;  %v563_v42 = vpop.permute.xlu1 %562 }
 0xa1e   :  { %v565_v43 = vmul.f32 %v1468_v35, %v563_v42 }
 0xa1f   :  { %541 = vrot.lane.b32.xlu0 %v539_v41, %s1585_s2 }
 0xa20   :  { %567 = vrot.lane.b32.xlu1 %v565_v43, %s1585_s2 }
 0xa91   :  { %v542_v45 = vpop.permute.xlu0 %541 }
 0xa92   :  { %v544_v48 = vadd.f32 %v542_v45, %v534_v44  ;;  %v568_v49 = vpop.permute.xlu1 %567 }
 0xa93   :  { %v570_v50 = vadd.f32 %v568_v49, %v560_v46  ;;  %v747_v49 = vrot.slane %v1717_v23, 5 }
 0xa94   :  { %1469 = vtanh.f32 %v544_v48 }
 0xa95   :  { %1471 = vtanh.f32 %v570_v50 }
 0xa9e   :  { %v1470_v51 = vpop.eup %1469 }
 0xa9f   :  { %v1472_v52 = vpop.eup %1471  ;;  %547 = vrot.lane.b32.xlu0 %v1470_v51, %s1584_s17 }
 0xaa0   :  { %573 = vrot.lane.b32.xlu1 %v1472_v52, %s1584_s17 }
 0xb11   :  { %v548_v53 = vpop.permute.xlu0 %547 }
 0xb12   :  { %v550_v54 = vmul.f32 %v1466_v34, %v548_v53  ;;  %v574_v55 = vpop.permute.xlu1 %573 }
 0xb13   :  { %v1793_v56 = vmul.f32 %v1468_v35, %v574_v55 }
 0xb14   :  { %583 = vrot.lane.b32.xlu0 %v550_v54, %s1585_s2 }
 0xb15   :  { %586 = vrot.lane.b32.xlu1 %v1793_v56, %s1584_s17 }
 0xb86   :  { %v584_v57 = vpop.permute.xlu0 %583 }
 0xb87   :  { %v587_v58 = vpop.permute.xlu1 %586 }
 0xb88   :  { %v589_v59 = vsel %vm250_vm4, %v584_v57, %v587_v58 }
 0xb89   :  { %v590_v60 = vpack.c.bf16 %v589_v59, %v589_v59 }
 0xb8b   :  { %1330 = vmatmul.mubr.msk.bf16.vlgmr.msra.gmra.mrb[8].mxu1 %vm176_vm5, %v590_v60 }
 0xb8c   :  { %819 = vmatpush1.bf16.msra.mxu1 %v1666_v5  ;;  %850 = vmatprep.mubr.bf16.mxu1 %v1581_v1 }
 0xb8d   :  { %820 = vmatprep.subr.bf16.mxu1 %v1669_v7 }
 0xb90   :  { %821 = vmatpush1.bf16.msra.mxu1 %v1671_v8 }
 0xb91   :  { %822 = vmatprep.subr.bf16.mxu1 %v1678_v10 }
 0xb94   :  { %823 = vmatpush1.bf16.msra.mxu1 %v1683_v13 }
 0xb95   :  { %824 = vmatprep.subr.bf16.mxu1 %v1685_v15 }
 0xb98   :  { %825 = vmatpush1.bf16.msra.mxu1 %v1691_v16 }
 0xb99   :  { %1042 = vmatprep.subr.bf16.mxu1 %v1664_v4 }
 0xc5e   :  { %v628_v62 = vpop.f32.mrb[8].mxu1 }
 0xc5f   :  { %v637_v63 = vadd.f32 %v635_v61, %v628_v62  ;;  %v630_v2 = vpop.f32.mrb[9].mxu1 }
 0xc60   :  { %v663_v3 = vadd.f32 %v630_v2, %v1736_v47  ;;  %v632_v6 = vpop.f32.mrb[10].mxu1 }
 0xc61   :  { %v1331_v9 = vmul.f32 -1.442695, %v637_v63  ;;  %v633_v12 = vpop.f32.mrb[11].mxu1 }
 0xc62   :  { %v1333_v14 = vmul.f32 -1.442695, %v663_v3 }
 0xc63   :  { %1473 = vpow2.f32 %v1331_v9 }
 0xc64   :  { %1475 = vpow2.f32 %v1333_v14 }
 0xc6d   :  { %v1474_v17 = vpop.eup %1473 }
 0xc6e   :  { %v1476_v18 = vpop.eup %1475  ;;  %v641_v19 = vadd.f32 1.0, %v1474_v17 }
 0xc6f   :  { %v667_v20 = vadd.f32 1.0, %v1476_v18 }
 0xc70   :  { %1477 = vrcp.f32 %v641_v19 }
 0xc71   :  { %1479 = vrcp.f32 %v667_v20 }
 0xc7a   :  { %v1478_v4 = vpop.eup %1477 }
 0xc7b   :  { %v1480_v21 = vpop.eup %1479  ;;  %v644_v22 = vmul.f32 2.0, %v1478_v4  ;;  %v646_v32 = vmul.f32 %v1478_v4, %v544_v48 }
 0xc7c   :  { %v670_v24 = vmul.f32 2.0, %v1480_v21  ;;  %v672_v34 = vmul.f32 %v1480_v21, %v570_v50 }
 0xc7d   :  { %v1332_v25 = vadd.f32 -1.0, %v644_v22 }
 0xc7e   :  { %v1334_v26 = vadd.f32 -1.0, %v670_v24 }
 0xc7f   :  { %648 = vrot.lane.b32.xlu0 %v1332_v25, %s1584_s17 }
 0xc80   :  { %674 = vrot.lane.b32.xlu1 %v1334_v26, %s1584_s17 }
 0xcf1   :  { %v649_v27 = vpop.permute.xlu0 %648 }
 0xcf2   :  { %v651_v29 = vmul.f32 %v1478_v4, %v649_v27  ;;  %v675_v30 = vpop.permute.xlu1 %674 }
 0xcf3   :  { %v677_v31 = vmul.f32 %v1480_v21, %v675_v30 }
 0xcf4   :  { %653 = vrot.lane.b32.xlu0 %v651_v29, %s1585_s2 }
 0xcf5   :  { %679 = vrot.lane.b32.xlu1 %v677_v31, %s1585_s2 }
 0xd66   :  { %v654_v33 = vpop.permute.xlu0 %653 }
 0xd67   :  { %v656_v35 = vadd.f32 %v654_v33, %v646_v32  ;;  %v680_v36 = vpop.permute.xlu1 %679 }
 0xd68   :  { %v682_v37 = vadd.f32 %v680_v36, %v672_v34 }
 0xd69   :  { %1481 = vtanh.f32 %v656_v35 }
 0xd6a   :  { %1483 = vtanh.f32 %v682_v37 }
 0xd73   :  { %v1482_v38 = vpop.eup %1481 }
 0xd74   :  { %v1484_v39 = vpop.eup %1483  ;;  %659 = vrot.lane.b32.xlu0 %v1482_v38, %s1584_s17 }
 0xd75   :  { %685 = vrot.lane.b32.xlu1 %v1484_v39, %s1584_s17 }
 0xde6   :  { %v660_v40 = vpop.permute.xlu0 %659 }
 0xde7   :  { %v662_v41 = vmul.f32 %v1478_v4, %v660_v40  ;;  %v686_v42 = vpop.permute.xlu1 %685 }
 0xde8   :  { %v1817_v43 = vmul.f32 %v1480_v21, %v686_v42 }
 0xde9   :  { %695 = vrot.lane.b32.xlu0 %v662_v41, %s1585_s2 }
 0xdea   :  { %698 = vrot.lane.b32.xlu1 %v1817_v43, %s1584_s17 }
 0xe5b   :  { %v696_v44 = vpop.permute.xlu0 %695 }
 0xe5c   :  { %v699_v45 = vpop.permute.xlu1 %698 }
 0xe5d   :  { %v701_v46 = vsel %vm250_vm4, %v696_v44, %v699_v45 }
 0xe5e   :  { %v702_v48 = vpack.c.bf16 %v701_v46, %v701_v46 }
 0xe60   :  { %1335 = vmatmul.mubr.msk.bf16.vlgmr.msra.gmra.mrb[12].mxu0 %vm176_vm5, %v702_v48 }
 0xe61   :  { %931 = vmatpush1.bf16.msra.mxu0 %v1666_v5  ;;  %962 = vmatprep.mubr.bf16.mxu0 %v1581_v1 }
 0xe62   :  { %932 = vmatprep.subr.bf16.mxu0 %v1669_v7 }
 0xe65   :  { %933 = vmatpush1.bf16.msra.mxu0 %v1671_v8 }
 0xe66   :  { %934 = vmatprep.subr.bf16.mxu0 %v1678_v10 }
 0xe69   :  { %935 = vmatpush1.bf16.msra.mxu0 %v1683_v13 }
 0xe6a   :  { %936 = vmatprep.subr.bf16.mxu0 %v1685_v15 }
 0xe6d   :  { %937 = vmatpush1.bf16.msra.mxu0 %v1691_v16 }
 0xe6e   :  { %1379 = vmatprep.subr.bf16.mxu0 %v1579_v0 }
 0xf33   :  { %v740_v50 = vpop.f32.mrb[12].mxu0 }
 0xf34   :  { %v749_v51 = vadd.f32 %v747_v49, %v740_v50  ;;  %v742_v52 = vpop.f32.mrb[13].mxu0 }
 0xf35   :  { %v775_v53 = vadd.f32 %v742_v52, %v1736_v47  ;;  %v744_v54 = vpop.f32.mrb[14].mxu0 }
 0xf36   :  { %v1336_v55 = vmul.f32 -1.442695, %v749_v51  ;;  %v745_v57 = vpop.f32.mrb[15].mxu0 }
 0xf37   :  { %v1338_v58 = vmul.f32 -1.442695, %v775_v53 }
 0xf38   :  { %1485 = vpow2.f32 %v1336_v55 }
 0xf39   :  { %1487 = vpow2.f32 %v1338_v58 }
 0xf42   :  { %v1486_v59 = vpop.eup %1485 }
 0xf43   :  { %v1488_v60 = vpop.eup %1487  ;;  %v753_v61 = vadd.f32 1.0, %v1486_v59 }
 0xf44   :  { %v779_v62 = vadd.f32 1.0, %v1488_v60 }
 0xf45   :  { %1489 = vrcp.f32 %v753_v61 }
 0xf46   :  { %1491 = vrcp.f32 %v779_v62 }
 0xf4f   :  { %v1490_v63 = vpop.eup %1489 }
 0xf50   :  { %v1492_v2 = vpop.eup %1491  ;;  %v756_v3 = vmul.f32 2.0, %v1490_v63  ;;  %v758_v20 = vmul.f32 %v1490_v63, %v656_v35 }
 0xf51   :  { %v782_v6 = vmul.f32 2.0, %v1492_v2  ;;  %v784_v21 = vmul.f32 %v1492_v2, %v682_v37  ;;  %v859_v37 = vrot.slane %v1717_v23, 6 }
 0xf52   :  { %v1337_v9 = vadd.f32 -1.0, %v756_v3 }
 0xf53   :  { %v1339_v12 = vadd.f32 -1.0, %v782_v6 }
 0xf54   :  { %760 = vrot.lane.b32.xlu0 %v1337_v9, %s1584_s17 }
 0xf55   :  { %786 = vrot.lane.b32.xlu1 %v1339_v12, %s1584_s17 }
 0xfc6   :  { %v761_v14 = vpop.permute.xlu0 %760 }
 0xfc7   :  { %v763_v17 = vmul.f32 %v1490_v63, %v761_v14  ;;  %v787_v18 = vpop.permute.xlu1 %786 }
 0xfc8   :  { %v789_v19 = vmul.f32 %v1492_v2, %v787_v18  ;;  %v971_v18 = vrot.slane %v1717_v23, 7 }
 0xfc9   :  { %765 = vrot.lane.b32.xlu0 %v763_v17, %s1585_s2 }
 0xfca   :  { %791 = vrot.lane.b32.xlu1 %v789_v19, %s1585_s2 }
0x103b   :  { %v766_v4 = vpop.permute.xlu0 %765 }
0x103c   :  { %v768_v22 = vadd.f32 %v766_v4, %v758_v20  ;;  %v792_v24 = vpop.permute.xlu1 %791 }
0x103d   :  { %v794_v25 = vadd.f32 %v792_v24, %v784_v21 }
0x103e   :  { %1493 = vtanh.f32 %v768_v22 }
0x103f   :  { %1495 = vtanh.f32 %v794_v25 }
0x1048   :  { %v1494_v26 = vpop.eup %1493 }
0x1049   :  { %v1496_v27 = vpop.eup %1495  ;;  %771 = vrot.lane.b32.xlu0 %v1494_v26, %s1584_s17 }
0x104a   :  { %797 = vrot.lane.b32.xlu1 %v1496_v27, %s1584_s17 }
0x10bb   :  { %v772_v29 = vpop.permute.xlu0 %771 }
0x10bc   :  { %v774_v30 = vmul.f32 %v1490_v63, %v772_v29  ;;  %v798_v31 = vpop.permute.xlu1 %797 }
0x10bd   :  { %v1841_v32 = vmul.f32 %v1492_v2, %v798_v31 }
0x10be   :  { %807 = vrot.lane.b32.xlu0 %v774_v30, %s1585_s2 }
0x10bf   :  { %810 = vrot.lane.b32.xlu1 %v1841_v32, %s1584_s17 }
0x1130   :  { %v808_v33 = vpop.permute.xlu0 %807 }
0x1131   :  { %v811_v34 = vpop.permute.xlu1 %810 }
0x1132   :  { %v813_v35 = vsel %vm250_vm4, %v808_v33, %v811_v34 }
0x1133   :  { %v814_v36 = vpack.c.bf16 %v813_v35, %v813_v35 }
0x1135   :  { %1340 = vmatmul.mubr.msk.bf16.vlgmr.msra.gmra.mrb[12].mxu1 %vm176_vm5, %v814_v36 }
0x1136   :  { %1043 = vmatpush1.bf16.msra.mxu1 %v1666_v5  ;;  %1074 = vmatprep.mubr.bf16.mxu1 %v1581_v1 }
0x1137   :  { %1044 = vmatprep.subr.bf16.mxu1 %v1669_v7 }
0x113a   :  { %1045 = vmatpush1.bf16.msra.mxu1 %v1671_v8 }
0x113b   :  { %1046 = vmatprep.subr.bf16.mxu1 %v1678_v10 }
0x113e   :  { %1047 = vmatpush1.bf16.msra.mxu1 %v1683_v13 }
0x113f   :  { %1048 = vmatprep.subr.bf16.mxu1 %v1685_v15 }
0x1142   :  { %1049 = vmatpush1.bf16.msra.mxu1 %v1691_v16 }
0x1143   :  { %1395 = vmatprep.subr.bf16.mxu1 %v1579_v0 }
0x1208   :  { %v852_v38 = vpop.f32.mrb[12].mxu1 }
0x1209   :  { %v861_v5 = vadd.f32 %v859_v37, %v852_v38  ;;  %v854_v39 = vpop.f32.mrb[13].mxu1 }
0x120a   :  { %v887_v1 = vadd.f32 %v854_v39, %v1736_v47  ;;  %v856_v7 = vpop.f32.mrb[14].mxu1 }
0x120b   :  { %v1341_v40 = vmul.f32 -1.442695, %v861_v5  ;;  %v857_v8 = vpop.f32.mrb[15].mxu1 }
0x120c   :  { %v1343_v41 = vmul.f32 -1.442695, %v887_v1 }
0x120d   :  { %1497 = vpow2.f32 %v1341_v40 }
0x120e   :  { %1499 = vpow2.f32 %v1343_v41 }
0x1217   :  { %v1498_v10 = vpop.eup %1497 }
0x1218   :  { %v1500_v13 = vpop.eup %1499  ;;  %v865_v15 = vadd.f32 1.0, %v1498_v10 }
0x1219   :  { %v891_v42 = vadd.f32 1.0, %v1500_v13 }
0x121a   :  { %1501 = vrcp.f32 %v865_v15 }
0x121b   :  { %1503 = vrcp.f32 %v891_v42 }
0x1224   :  { %v1502_v16 = vpop.eup %1501 }
0x1225   :  { %v1504_v44 = vpop.eup %1503  ;;  %v868_v45 = vmul.f32 2.0, %v1502_v16  ;;  %v870_v54 = vmul.f32 %v1502_v16, %v768_v22 }
0x1226   :  { %v894_v46 = vmul.f32 2.0, %v1504_v44  ;;  %v896_v57 = vmul.f32 %v1504_v44, %v794_v25 }
0x1227   :  { %v1342_v48 = vadd.f32 -1.0, %v868_v45 }
0x1228   :  { %v1344_v49 = vadd.f32 -1.0, %v894_v46 }
0x1229   :  { %872 = vrot.lane.b32.xlu0 %v1342_v48, %s1584_s17 }
0x122a   :  { %898 = vrot.lane.b32.xlu1 %v1344_v49, %s1584_s17 }
0x129b   :  { %v873_v50 = vpop.permute.xlu0 %872 }
0x129c   :  { %v875_v51 = vmul.f32 %v1502_v16, %v873_v50  ;;  %v899_v52 = vpop.permute.xlu1 %898 }
0x129d   :  { %v901_v53 = vmul.f32 %v1504_v44, %v899_v52 }
0x129e   :  { %877 = vrot.lane.b32.xlu0 %v875_v51, %s1585_s2 }
0x129f   :  { %903 = vrot.lane.b32.xlu1 %v901_v53, %s1585_s2 }
0x1310   :  { %v878_v55 = vpop.permute.xlu0 %877 }
0x1311   :  { %v880_v58 = vadd.f32 %v878_v55, %v870_v54  ;;  %v904_v59 = vpop.permute.xlu1 %903 }
0x1312   :  { %v906_v60 = vadd.f32 %v904_v59, %v896_v57 }
0x1313   :  { %1505 = vtanh.f32 %v880_v58 }
0x1314   :  { %1507 = vtanh.f32 %v906_v60 }
0x131d   :  { %v1506_v61 = vpop.eup %1505 }
0x131e   :  { %v1508_v62 = vpop.eup %1507  ;;  %883 = vrot.lane.b32.xlu0 %v1506_v61, %s1584_s17 }
0x131f   :  { %909 = vrot.lane.b32.xlu1 %v1508_v62, %s1584_s17 }
0x1390   :  { %v884_v63 = vpop.permute.xlu0 %883 }
0x1391   :  { %v886_v2 = vmul.f32 %v1502_v16, %v884_v63  ;;  %v910_v3 = vpop.permute.xlu1 %909 }
0x1392   :  { %v1865_v6 = vmul.f32 %v1504_v44, %v910_v3 }
0x1393   :  { %919 = vrot.lane.b32.xlu0 %v886_v2, %s1585_s2 }
0x1394   :  { %922 = vrot.lane.b32.xlu1 %v1865_v6, %s1584_s17 }
0x1405   :  { %v920_v9 = vpop.permute.xlu0 %919 }
0x1406   :  { %v923_v12 = vpop.permute.xlu1 %922 }
0x1407   :  { %v925_v14 = vsel %vm250_vm4, %v920_v9, %v923_v12 }
0x1408   :  { %v926_v17 = vpack.c.bf16 %v925_v14, %v925_v14 }
0x140a   :  { %1345 = vmatmul.mubr.msk.bf16.vlgmr.msra.gmra.mrb[16].mxu0 %vm176_vm5, %v926_v17 }
0x140b   :  { %1383 = vmatprep.mubr.msk.bf16.mxu0 %vm1580_vm1, %v1579_v0 }
0x14dd   :  { %v964_v19 = vpop.f32.mrb[16].mxu0 }
0x14de   :  { %v973_v20 = vadd.f32 %v971_v18, %v964_v19  ;;  %v966_v4 = vpop.f32.mrb[17].mxu0  ;;  %v1428_v19 = vld [vmem:[%s1949_s5 + $0x8] sm:$0xff]  }
0x14df   :  { %v999_v21 = vadd.f32 %v966_v4, %v1736_v47  ;;  %v968_v22 = vpop.f32.mrb[18].mxu0 }
0x14e0   :  { %v1346_v24 = vmul.f32 -1.442695, %v973_v20  ;;  %v969_v25 = vpop.f32.mrb[19].mxu0 }
0x14e1   :  { %v1348_v26 = vmul.f32 -1.442695, %v999_v21  ;;  %v1429_v25 = vld [vmem:[%s1951_s7] sm:$0xff]  }
0x14e2   :  { %1509 = vpow2.f32 %v1346_v24 }
0x14e3   :  { %1511 = vpow2.f32 %v1348_v26  ;;  %v1353_v26 = vld [vmem:[%s1950_s6] ss:$0 sm:$0xff] }
0x14ec   :  { %v1510_v27 = vpop.eup %1509 }
0x14ed   :  { %v1512_v29 = vpop.eup %1511  ;;  %v977_v30 = vadd.f32 1.0, %v1510_v27 }
0x14ee   :  { %v1003_v31 = vadd.f32 1.0, %v1512_v29 }
0x14ef   :  { %1513 = vrcp.f32 %v977_v30 }
0x14f0   :  { %1515 = vrcp.f32 %v1003_v31 }
0x14f9   :  { %v1514_v33 = vpop.eup %1513 }
0x14fa   :  { %v1516_v34 = vpop.eup %1515  ;;  %v980_v23 = vmul.f32 2.0, %v1514_v33  ;;  %v982_v7 = vmul.f32 %v1514_v33, %v880_v58 }
0x14fb   :  { %v1006_v35 = vmul.f32 2.0, %v1516_v34  ;;  %v1008_v8 = vmul.f32 %v1516_v34, %v906_v60 }
0x14fc   :  { %v1347_v36 = vadd.f32 -1.0, %v980_v23 }
0x14fd   :  { %v1349_v37 = vadd.f32 -1.0, %v1006_v35  ;;  %v1430_v35 = vld [vmem:[%s1951_s7 + $0x8] sm:$0xff]  }
0x14fe   :  { %984 = vrot.lane.b32.xlu0 %v1347_v36, %s1584_s17 }
0x14ff   :  { %1010 = vrot.lane.b32.xlu1 %v1349_v37, %s1584_s17 }
0x1570   :  { %v985_v38 = vpop.permute.xlu0 %984 }
0x1571   :  { %v987_v5 = vmul.f32 %v1514_v33, %v985_v38  ;;  %v1011_v39 = vpop.permute.xlu1 %1010 }
0x1572   :  { %v1013_v1 = vmul.f32 %v1516_v34, %v1011_v39 }
0x1573   :  { %989 = vrot.lane.b32.xlu0 %v987_v5, %s1585_s2 }
0x1574   :  { %1015 = vrot.lane.b32.xlu1 %v1013_v1, %s1585_s2 }
0x15e5   :  { %v990_v40 = vpop.permute.xlu0 %989 }
0x15e6   :  { %v992_v41 = vadd.f32 %v990_v40, %v982_v7  ;;  %v1016_v10 = vpop.permute.xlu1 %1015  ;;  %v1358_v7 = vld [vmem:[%s1952_s8] ss:$0 sm:$0xff] }
0x15e7   :  { %v1018_v13 = vadd.f32 %v1016_v10, %v1008_v8 }
0x15e8   :  { %1517 = vtanh.f32 %v992_v41 }
0x15e9   :  { %1519 = vtanh.f32 %v1018_v13 }
0x15f2   :  { %v1518_v15 = vpop.eup %1517 }
0x15f3   :  { %v1520_v42 = vpop.eup %1519  ;;  %995 = vrot.lane.b32.xlu0 %v1518_v15, %s1584_s17 }
0x15f4   :  { %1021 = vrot.lane.b32.xlu1 %v1520_v42, %s1584_s17 }
0x1665   :  { %v996_v16 = vpop.permute.xlu0 %995 }
0x1666   :  { %v998_v44 = vmul.f32 %v1514_v33, %v996_v16  ;;  %v1022_v45 = vpop.permute.xlu1 %1021 }
0x1667   :  { %v1024_v46 = vmul.f32 %v1516_v34, %v1022_v45 }
0x1668   :  { %1031 = vrot.lane.b32.xlu0 %v998_v44, %s1585_s2 }
0x1669   :  { %1034 = vrot.lane.b32.xlu1 %v1024_v46, %s1584_s17 }
0x16da   :  { %v1032_v48 = vpop.permute.xlu0 %1031 }
0x16db   :  { %v1035_v49 = vpop.permute.xlu1 %1034 }
0x16dc   :  { %v1037_v50 = vsel %vm250_vm4, %v1032_v48, %v1035_v49 }
0x16dd   :  { %v1038_v51 = vpack.c.bf16 %v1037_v50, %v1037_v50 }
0x16df   :  { %1350 = vmatmul.mubr.msk.bf16.vlgmr.msra.gmra.mrb[16].mxu1 %vm176_vm5, %v1038_v51 }
0x16e0   :  { %1399 = vmatprep.mubr.msk.bf16.mxu1 %vm1580_vm1, %v1579_v0  ;;  %1396 = vmatpush3.bf16.msra.mxu1 %v1429_v25 }
0x16e1   :  { %1397 = vmatprep.subr.bf16.mxu1 %v1579_v0 }
0x16e4   :  { %1398 = vmatpush3.bf16.msra.mxu1 %v1430_v35 }
0x17b2   :  { %v1076_v52 = vpop.f32.mrb[16].mxu1 }
0x17b3   :  { %v1077_v53 = vpop.f32.mrb[17].mxu1 }
0x17b4   :  { %v1082_v54 = vadd.f32 %v1077_v53, %v1736_v47  ;;  %v1079_v55 = vpop.f32.mrb[18].mxu1 }
0x17b5   :  { %v1080_v57 = vpop.f32.mrb[19].mxu1 }
0x17b6   :  { %v1351_v58 = vmul.f32 -1.442695, %v1082_v54 }
0x17b8   :  { %1521 = vpow2.f32 %v1351_v58 }
0x17c2   :  { %v1522_v59 = vpop.eup %1521 }
0x17c3   :  { %v1086_v60 = vadd.f32 1.0, %v1522_v59 }
0x17c5   :  { %1523 = vrcp.f32 %v1086_v60 }
0x17cf   :  { %v1524_v61 = vpop.eup %1523 }
0x17d0   :  { %v1089_v62 = vmul.f32 2.0, %v1524_v61  ;;  %v1091_v47 = vmul.f32 %v1524_v61, %v1018_v13 }
0x17d2   :  { %v1352_v63 = vadd.f32 -1.0, %v1089_v62 }
0x17d4   :  { %1093 = vrot.lane.b32.xlu0 %v1352_v63, %s1584_s17 }
0x1846   :  { %v1094_v2 = vpop.permute.xlu0 %1093 }
0x1847   :  { %v1096_v3 = vmul.f32 %v1524_v61, %v1094_v2 }
0x1849   :  { %1098 = vrot.lane.b32.xlu1 %v1096_v3, %s1585_s2 }
0x184d   :  { %353 = vrot.lane.b32.xlu1 %v1745_v28, %s1585_s2 }
0x1851   :  { %578 = vrot.lane.b32.xlu1 %v1793_v56, %s1585_s2 }
0x1855   :  { %802 = vrot.lane.b32.xlu1 %v1841_v32, %s1585_s2  ;;  %v1427_v32 = vld [vmem:[%s1949_s5] sm:$0xff]  }
0x1856   :  { %1380 = vmatpush3.bf16.msra.mxu0 %v1427_v32 }
0x1857   :  { %1381 = vmatprep.subr.bf16.mxu0 %v1579_v0 }
0x1859   :  { %1026 = vrot.lane.b32.xlu1 %v1024_v46, %s1585_s2 }
0x185a   :  { %1382 = vmatpush3.bf16.msra.mxu0 %v1428_v19 }
0x185b   :  { %1387 = vmatprep.subr.bf16.mxu0 %v1579_v0 }
0x18bb   :  { %v1099_v9 = vpop.permute.xlu1 %1098 }
0x18bc   :  { %v1101_v12 = vadd.f32 %v1099_v9, %v1091_v47 }
0x18be   :  { %1525 = vtanh.f32 %v1101_v12 }
0x18bf   :  { %v354_v14 = vpop.permute.xlu1 %353 }
0x18c0   :  { %357 = vst.msk [vmem:[#allocation2] sm:$0x1] %vm356_vm6, %v354_v14 }
0x18c3   :  { %v579_v17 = vpop.permute.xlu1 %578 }
0x18c4   :  { %581 = vst.msk [vmem:[#allocation2 + $0x2] sm:$0x1] %vm356_vm6, %v579_v17 }
0x18c7   :  { %v803_v28 = vpop.permute.xlu1 %802 }
0x18c8   :  { %v1526_v18 = vpop.eup %1525  ;;  %805 = vst.msk [vmem:[#allocation2 + $0x4] sm:$0x1] %vm356_vm6, %v803_v28 }
0x18c9   :  { %1104 = vrot.lane.b32.xlu0 %v1526_v18, %s1584_s17 }
0x18cb   :  { %v1027_v56 = vpop.permute.xlu1 %1026 }
0x18cc   :  { %1029 = vst.msk [vmem:[#allocation2 + $0x6] sm:$0x1] %vm356_vm6, %v1027_v56 }
0x18cd   :  { %466 = vrot.lane.b32.xlu0 %v1769_v11, %s1585_s2 }
0x18d1   :  { %690 = vrot.lane.b32.xlu0 %v1817_v43, %s1585_s2 }
0x18d5   :  { %914 = vrot.lane.b32.xlu0 %v1865_v6, %s1585_s2 }
0x193b   :  { %v1105_v11 = vpop.permute.xlu0 %1104 }
0x193c   :  { %v1107_v20 = vmul.f32 %v1524_v61, %v1105_v11 }
0x193e   :  { %1109 = vrot.lane.b32.xlu0 %v1107_v20, %s1585_s2 }
0x193f   :  { %v467_v43 = vpop.permute.xlu0 %466 }
0x1940   :  { %469 = vst.msk [vmem:[#allocation2 + $0x1] sm:$0x1] %vm356_vm6, %v467_v43 }
0x1943   :  { %v691_v6 = vpop.permute.xlu0 %690 }
0x1944   :  { %693 = vst.msk [vmem:[#allocation2 + $0x3] sm:$0x1] %vm356_vm6, %v691_v6 }
0x1947   :  { %v915_v4 = vpop.permute.xlu0 %914 }
0x1948   :  { %917 = vst.msk [vmem:[#allocation2 + $0x5] sm:$0x1] %vm356_vm6, %v915_v4 }
0x19b0   :  { %v1110_v21 = vpop.permute.xlu0 %1109 }
0x19b1   :  { %1112 = vst.msk [vmem:[#allocation2 + $0x7] sm:$0x1] %vm356_vm6, %v1110_v21 }
0x19b8   :  { %v1118_v22 = vld [vmem:[#allocation2] sm:$0xff] }
0x19b9   :  { %v1119_v24 = vpack.c.bf16 %v1118_v22, %v1118_v22 }
0x19bb   :  { %1384 = vmatmul.mubr.msk.bf16.vlgmr.msra.gmra.mrb[20].mxu0 %vm250_vm4, %v1119_v24 }
0x19bc   :  { %1388 = vmatpush3.bf16.msra.mxu0 %v1427_v32  ;;  %1391 = vmatprep.mubr.msk.bf16.mxu0 %vm1580_vm1, %v1579_v0 }
0x19bd   :  { %1389 = vmatprep.subr.bf16.mxu0 %v1579_v0 }
0x19c0   :  { %1390 = vmatpush3.bf16.msra.mxu0 %v1428_v19 }
0x1a8e   :  { %v1175_v27 = vpop.f32.mrb[20].mxu0 }
0x1a8f   :  { %v1176_v29 = vadd.f32 %v1353_v26, %v1175_v27  ;;  %v1385_v30 = vpop.f32.mrb[21].mxu0 }
0x1a90   :  { %v1178_v31 = vpop.f32.mrb[22].mxu0 }
0x1a91   :  { %v1181_v33 = vmax.f32 %v1176_v29, 0.0  ;;  %v1386_v34 = vpop.f32.mrb[23].mxu0 }
0x1a93   :  { %v1182_v23 = vpack.c.bf16 %v1181_v33, %v1181_v33 }
0x1a95   :  { %1392 = vmatmul.mubr.msk.bf16.vlgmr.msra.gmra.mrb[24].mxu0 %vm250_vm4, %v1182_v23 }
0x1b68   :  { %v1220_v36 = vpop.f32.mrb[24].mxu0 }
0x1b69   :  { %v1221_v0 = vadd.f32 %v1353_v26, %v1220_v36  ;;  %v1393_v37 = vpop.f32.mrb[25].mxu0 }
0x1b6a   :  { %v1223_v38 = vpop.f32.mrb[26].mxu0 }
0x1b6b   :  { %v1226_v5 = vmax.f32 %v1221_v0, 0.0  ;;  %v1394_v39 = vpop.f32.mrb[27].mxu0 }
0x1b6d   :  { %v1227_v1 = vpack.c.bf16 %v1226_v5, %v1226_v5 }
0x1b6f   :  { %1400 = vmatmul.mubr.msk.bf16.vlgmr.msra.gmra.mrb[20].mxu1 %vm250_vm4, %v1227_v1 }
0x1c42   :  { %v1288_v40 = vpop.f32.mrb[20].mxu1 }
0x1c43   :  { %v1289_v8 = vadd.f32 %v1358_v7, %v1288_v40  ;;  %v1401_v41 = vpop.f32.mrb[21].mxu1 }
0x1c44   :  { %v1291_v10 = vpop.f32.mrb[22].mxu1 }
0x1c45   :  { %1295 = vst.msk [vmem:[%s1953_s9] sm:$0xff] %vm1294_vm7, %v1289_v8  ;;  %v1402_v13 = vpop.f32.mrb[23].mxu1 }
0x1c46   :  { %1300 = vsyncpa [#allocation4], 1 }
0x1c47   :  { %1301 = vsyncpa [#allocation6], 1 }

</bundles_post_ra>
